<compile_context>
chip_gen: v6e
topology: v6e:2x2x1
jax: 0.10.0
libtpu: 0.0.40
codegen_flags: <defaults>
</compile_context>

<pallas_src>
import functools

import jax
import jax.numpy as jnp
import numpy as np
from jax.experimental import pallas as pl
from jax.experimental.pallas import tpu as pltpu


def _round_up(x, m):
    return ((x + m - 1) // m) * m


# Packed gate slot order in the padded weights: [i, f, o, g].
# PyTorch's packed order is [i, f, g, o]; map slot -> original gate index.
_GATE_SLOTS = (0, 1, 3, 2)


def tinylm_kernel(x_ref, emb_ref, wih_ref, whh_ref, b_ref, wfc_ref, bfc_ref,
                  out_ref, *, T, Bp, Hp):
    Vp = emb_ref.shape[0]
    TB = T * Bp

    # ---- Phase 1: hoisted input path (no recurrent dependency) -------------
    #   ew    = emb @ W_ih                      [Vp, 4Hp]
    #   xproj = onehot(tokens) @ ew + bias      [T*Bp, 4Hp]  (== emb[x] @ W_ih + b)
    ew = jnp.dot(emb_ref[...], wih_ref[...],
                 preferred_element_type=jnp.float32)                 # [Vp, 4Hp]
    tok = x_ref[...]                                                 # [TB, 1] int32
    onehot = (jax.lax.broadcasted_iota(jnp.int32, (TB, Vp), 1)
              == tok).astype(jnp.float32)                            # [TB, Vp]
    xproj = jnp.dot(onehot, ew,
                    preferred_element_type=jnp.float32) + b_ref[...]  # [TB, 4Hp]

    whh = whh_ref[...]                                               # [Hp, 4Hp]

    # ---- Phase 2: serial recurrence (fully unrolled, static T) -------------
    h = jnp.zeros((Bp, Hp), jnp.float32)
    c = jnp.zeros((Bp, Hp), jnp.float32)
    for t in range(T):
        x_t = xproj[t * Bp:(t + 1) * Bp]          # static, sublane-tile aligned
        gates = x_t + jnp.dot(h, whh, preferred_element_type=jnp.float32)
        # Gates packed [i | f | o | g], each slot Hp=128k wide -> lane-aligned.
        ifo = jax.nn.sigmoid(gates[:, 0:3 * Hp])
        g_g = jnp.tanh(gates[:, 3 * Hp:4 * Hp])
        i_g = ifo[:, 0:Hp]
        f_g = ifo[:, Hp:2 * Hp]
        o_g = ifo[:, 2 * Hp:3 * Hp]
        c = f_g * c + i_g * g_g
        h = o_g * jnp.tanh(c)

    # ---- Phase 3: final projection, lane-dense [Bp, Vp] store ---------------
    out_ref[...] = (jnp.dot(h, wfc_ref[...],
                            preferred_element_type=jnp.float32) + bfc_ref[...])


def prepare_params(raw, hidden_pad, vocab_pad):
    """Pre-transpose, fold biases, repack gates as [i,f,o,g], zero-pad to tiles."""
    emb, w_ih, w_hh, b_ih, b_hh, w_fc, b_fc = raw
    V, E = emb.shape
    H = w_hh.shape[1]
    Hp, Vp = hidden_pad, vocab_pad

    wih_t = w_ih.T                      # [E, 4H], columns grouped [i|f|g|o]
    whh_t = w_hh.T                      # [H, 4H]
    bias = b_ih + b_hh                  # [4H]

    emb_p = jnp.zeros((Vp, E), jnp.float32).at[:V].set(emb)
    wih_p = jnp.zeros((E, 4 * Hp), jnp.float32)
    whh_p = jnp.zeros((Hp, 4 * Hp), jnp.float32)
    b_p = jnp.zeros((1, 4 * Hp), jnp.float32)
    for slot, g in enumerate(_GATE_SLOTS):
        wih_p = wih_p.at[:, slot * Hp:slot * Hp + H].set(wih_t[:, g * H:(g + 1) * H])
        whh_p = whh_p.at[:H, slot * Hp:slot * Hp + H].set(whh_t[:, g * H:(g + 1) * H])
        b_p = b_p.at[0, slot * Hp:slot * Hp + H].set(bias[g * H:(g + 1) * H])
    wfc_p = jnp.zeros((Hp, Vp), jnp.float32).at[:H, :V].set(w_fc.T)
    bfc_p = jnp.zeros((1, Vp), jnp.float32).at[0, :V].set(b_fc)
    return emb_p, wih_p, whh_p, b_p, wfc_p, bfc_p


def tinylm_forward(x, prepared, vocab_size):
    emb_p, wih_p, whh_p, b_p, wfc_p, bfc_p = prepared
    B, T = x.shape
    Vp, E = emb_p.shape
    Hp = whh_p.shape[0]
    Bp = _round_up(max(B, 1), 8)

    # Time-major tokens, batch padded (with token 0) to a sublane multiple.
    x_tm = jnp.zeros((T, Bp), jnp.int32).at[:, :B].set(x.T.astype(jnp.int32))
    x_tok = x_tm.reshape(T * Bp, 1)

    operands = (x_tok, emb_p, wih_p, whh_p, b_p, wfc_p, bfc_p)
    total_bytes = int(sum(int(np.prod(a.shape)) * a.dtype.itemsize for a in operands)
                      + Bp * Vp * 4)
    flops = int(2 * (Vp * E * 4 * Hp            # emb @ W_ih
                     + T * Bp * Vp * 4 * Hp     # onehot @ ew
                     + T * Bp * Hp * 4 * Hp     # h @ W_hh per step
                     + Bp * Hp * Vp))           # final projection
    transcendentals = int(T * Bp * 5 * Hp)      # 4 gate activations + tanh(c)

    out_p = pl.pallas_call(
        functools.partial(tinylm_kernel, T=T, Bp=Bp, Hp=Hp),
        out_shape=jax.ShapeDtypeStruct((Bp, Vp), jnp.float32),
        in_specs=[pl.BlockSpec(memory_space=pltpu.MemorySpace.VMEM)] * 7,
        out_specs=pl.BlockSpec(memory_space=pltpu.MemorySpace.VMEM),
        compiler_params=pltpu.CompilerParams(
            vmem_limit_bytes=max(4 << 20, 8 * total_bytes)),
        cost_estimate=pl.CostEstimate(flops=flops,
                                      transcendentals=transcendentals,
                                      bytes_accessed=total_bytes),
    )(*operands)
    return out_p[:B, :vocab_size]


def make_params(key, vocab_size, embed_dim, hidden_dim):
    """Raw PyTorch-layout parameters (same layout as nn.Embedding/LSTM/Linear)."""
    ks = jax.random.split(key, 7)
    emb = jax.random.normal(ks[0], (vocab_size, embed_dim), jnp.float32) * 0.1
    w_ih = jax.random.normal(ks[1], (4 * hidden_dim, embed_dim), jnp.float32) * 0.1
    w_hh = jax.random.normal(ks[2], (4 * hidden_dim, hidden_dim), jnp.float32) * 0.1
    b_ih = jax.random.normal(ks[3], (4 * hidden_dim,), jnp.float32) * 0.1
    b_hh = jax.random.normal(ks[4], (4 * hidden_dim,), jnp.float32) * 0.1
    w_fc = jax.random.normal(ks[5], (vocab_size, hidden_dim), jnp.float32) * 0.1
    b_fc = jax.random.normal(ks[6], (vocab_size,), jnp.float32) * 0.1
    return (emb, w_ih, w_hh, b_ih, b_hh, w_fc, b_fc)


def reference_forward(x, raw):
    """Plain-JAX reference matching torch semantics (gate order i,f,g,o)."""
    emb, w_ih, w_hh, b_ih, b_hh, w_fc, b_fc = raw
    B, T = x.shape
    H = w_hh.shape[1]
    e = emb[x]                                       # [B, T, E]
    h = jnp.zeros((B, H), jnp.float32)
    c = jnp.zeros((B, H), jnp.float32)
    for t in range(T):
        gates = e[:, t, :] @ w_ih.T + h @ w_hh.T + b_ih + b_hh
        i_g = jax.nn.sigmoid(gates[:, 0 * H:1 * H])
        f_g = jax.nn.sigmoid(gates[:, 1 * H:2 * H])
        g_g = jnp.tanh(gates[:, 2 * H:3 * H])
        o_g = jax.nn.sigmoid(gates[:, 3 * H:4 * H])
        c = f_g * c + i_g * g_g
        h = o_g * jnp.tanh(c)
    return h @ w_fc.T + b_fc


if __name__ == "__main__":
    vocab_size, embed_dim, hidden_dim, context_size = 32, 16, 32, 8
    batch = 2

    key = jax.random.PRNGKey(0)
    k_tok, k_par = jax.random.split(key)
    x = jax.random.randint(k_tok, (batch, context_size), 0, vocab_size,
                           dtype=jnp.int32)
    raw = make_params(k_par, vocab_size, embed_dim, hidden_dim)

    Hp = _round_up(hidden_dim, 128)
    Vp = _round_up(vocab_size, 128)
    prepared = prepare_params(raw, Hp, Vp)

    out = tinylm_forward(x, prepared, vocab_size)
    out = jax.block_until_ready(out)

    ref = reference_forward(x, raw)
    np.testing.assert_allclose(np.asarray(out), np.asarray(ref),
                               rtol=1e-4, atol=1e-4)
    print("KERNEL_OK")
</pallas_src>

<mosaic_0001>
module attributes {stable_mosaic.version = 11 : i64} {
  func.func @tinylm_kernel(%arg0: memref<64x1xi32, #tpu.memory_space<vmem>>, %arg1: memref<128x16xf32, #tpu.memory_space<vmem>>, %arg2: memref<16x512xf32, #tpu.memory_space<vmem>>, %arg3: memref<128x512xf32, #tpu.memory_space<vmem>>, %arg4: memref<1x512xf32, #tpu.memory_space<vmem>>, %arg5: memref<128x128xf32, #tpu.memory_space<vmem>>, %arg6: memref<1x128xf32, #tpu.memory_space<vmem>>, %arg7: memref<8x128xf32, #tpu.memory_space<vmem>>) attributes {dimension_semantics = [], scalar_prefetch = 0 : i64, scratch_operands = 0 : i64, tpu.core_type = #tpu.core_type<tc>} {
    %c0 = arith.constant 0 : index
    %c0_0 = arith.constant 0 : index
    %0 = vector.load %arg1[%c0, %c0_0] : memref<128x16xf32, #tpu.memory_space<vmem>>, vector<128x16xf32>
    %c0_1 = arith.constant 0 : index
    %c0_2 = arith.constant 0 : index
    %1 = vector.load %arg2[%c0_1, %c0_2] : memref<16x512xf32, #tpu.memory_space<vmem>>, vector<16x512xf32>
    %cst = arith.constant dense<0.000000e+00> : vector<128x512xf32>
    %2 = tpu.matmul %0, %1, %cst {dimension_numbers = #tpu.dot_dimension_numbers<[1], [0], [0], [1], [0, 0, 1, 1], [], []>} : vector<128x16xf32>, vector<16x512xf32>, vector<128x512xf32> -> vector<128x512xf32>
    %c0_3 = arith.constant 0 : index
    %c0_4 = arith.constant 0 : index
    %3 = vector.load %arg0[%c0_3, %c0_4] : memref<64x1xi32, #tpu.memory_space<vmem>>, vector<64x1xi32>
    %4 = tpu.iota {dimensions = array<i32: 1>} : vector<64x128xi32>
    %5 = vector.broadcast %3 : vector<64x1xi32> to vector<64x128xi32>
    %6 = arith.cmpi eq, %4, %5 : vector<64x128xi32>
    %7 = arith.extui %6 : vector<64x128xi1> to vector<64x128xi32>
    %8 = arith.sitofp %7 : vector<64x128xi32> to vector<64x128xf32>
    %cst_5 = arith.constant dense<0.000000e+00> : vector<64x512xf32>
    %9 = tpu.matmul %8, %2, %cst_5 {dimension_numbers = #tpu.dot_dimension_numbers<[1], [0], [0], [1], [0, 0, 1, 1], [], []>} : vector<64x128xf32>, vector<128x512xf32>, vector<64x512xf32> -> vector<64x512xf32>
    %c0_6 = arith.constant 0 : index
    %c0_7 = arith.constant 0 : index
    %10 = vector.load %arg4[%c0_6, %c0_7] : memref<1x512xf32, #tpu.memory_space<vmem>>, vector<1x512xf32>
    %11 = vector.broadcast %10 : vector<1x512xf32> to vector<64x512xf32>
    %12 = arith.addf %9, %11 : vector<64x512xf32>
    %c0_8 = arith.constant 0 : index
    %c0_9 = arith.constant 0 : index
    %13 = vector.load %arg3[%c0_8, %c0_9] : memref<128x512xf32, #tpu.memory_space<vmem>>, vector<128x512xf32>
    %cst_10 = arith.constant 0.000000e+00 : f32
    %14 = vector.broadcast %cst_10 : f32 to vector<8x128xf32>
    %cst_11 = arith.constant 0.000000e+00 : f32
    %15 = vector.broadcast %cst_11 : f32 to vector<8x128xf32>
    %16 = vector.extract_strided_slice %12 {offsets = [0, 0], sizes = [8, 512], strides = [1, 1]} : vector<64x512xf32> to vector<8x512xf32>
    %cst_12 = arith.constant dense<0.000000e+00> : vector<8x512xf32>
    %17 = tpu.matmul %14, %13, %cst_12 {dimension_numbers = #tpu.dot_dimension_numbers<[1], [0], [0], [1], [0, 0, 1, 1], [], []>} : vector<8x128xf32>, vector<128x512xf32>, vector<8x512xf32> -> vector<8x512xf32>
    %18 = arith.addf %16, %17 : vector<8x512xf32>
    %19 = vector.extract_strided_slice %18 {offsets = [0, 0], sizes = [8, 384], strides = [1, 1]} : vector<8x512xf32> to vector<8x384xf32>
    %20 = arith.negf %19 : vector<8x384xf32>
    %21 = math.exp %20 : vector<8x384xf32>
    %cst_13 = arith.constant 1.000000e+00 : f32
    %22 = vector.broadcast %cst_13 : f32 to vector<8x384xf32>
    %23 = arith.addf %22, %21 : vector<8x384xf32>
    %24 = arith.divf %22, %23 : vector<8x384xf32>
    %25 = vector.extract_strided_slice %18 {offsets = [0, 384], sizes = [8, 128], strides = [1, 1]} : vector<8x512xf32> to vector<8x128xf32>
    %26 = math.tanh %25 : vector<8x128xf32>
    %27 = vector.extract_strided_slice %24 {offsets = [0, 0], sizes = [8, 128], strides = [1, 1]} : vector<8x384xf32> to vector<8x128xf32>
    %28 = vector.extract_strided_slice %24 {offsets = [0, 128], sizes = [8, 128], strides = [1, 1]} : vector<8x384xf32> to vector<8x128xf32>
    %29 = vector.extract_strided_slice %24 {offsets = [0, 256], sizes = [8, 128], strides = [1, 1]} : vector<8x384xf32> to vector<8x128xf32>
    %30 = arith.mulf %28, %15 : vector<8x128xf32>
    %31 = arith.mulf %27, %26 : vector<8x128xf32>
    %32 = arith.addf %30, %31 : vector<8x128xf32>
    %33 = math.tanh %32 : vector<8x128xf32>
    %34 = arith.mulf %29, %33 : vector<8x128xf32>
    %35 = vector.extract_strided_slice %12 {offsets = [8, 0], sizes = [8, 512], strides = [1, 1]} : vector<64x512xf32> to vector<8x512xf32>
    %cst_14 = arith.constant dense<0.000000e+00> : vector<8x512xf32>
    %36 = tpu.matmul %34, %13, %cst_14 {dimension_numbers = #tpu.dot_dimension_numbers<[1], [0], [0], [1], [0, 0, 1, 1], [], []>} : vector<8x128xf32>, vector<128x512xf32>, vector<8x512xf32> -> vector<8x512xf32>
    %37 = arith.addf %35, %36 : vector<8x512xf32>
    %38 = vector.extract_strided_slice %37 {offsets = [0, 0], sizes = [8, 384], strides = [1, 1]} : vector<8x512xf32> to vector<8x384xf32>
    %39 = arith.negf %38 : vector<8x384xf32>
    %40 = math.exp %39 : vector<8x384xf32>
    %cst_15 = arith.constant 1.000000e+00 : f32
    %41 = vector.broadcast %cst_15 : f32 to vector<8x384xf32>
    %42 = arith.addf %41, %40 : vector<8x384xf32>
    %43 = arith.divf %41, %42 : vector<8x384xf32>
    %44 = vector.extract_strided_slice %37 {offsets = [0, 384], sizes = [8, 128], strides = [1, 1]} : vector<8x512xf32> to vector<8x128xf32>
    %45 = math.tanh %44 : vector<8x128xf32>
    %46 = vector.extract_strided_slice %43 {offsets = [0, 0], sizes = [8, 128], strides = [1, 1]} : vector<8x384xf32> to vector<8x128xf32>
    %47 = vector.extract_strided_slice %43 {offsets = [0, 128], sizes = [8, 128], strides = [1, 1]} : vector<8x384xf32> to vector<8x128xf32>
    %48 = vector.extract_strided_slice %43 {offsets = [0, 256], sizes = [8, 128], strides = [1, 1]} : vector<8x384xf32> to vector<8x128xf32>
    %49 = arith.mulf %47, %32 : vector<8x128xf32>
    %50 = arith.mulf %46, %45 : vector<8x128xf32>
    %51 = arith.addf %49, %50 : vector<8x128xf32>
    %52 = math.tanh %51 : vector<8x128xf32>
    %53 = arith.mulf %48, %52 : vector<8x128xf32>
    %54 = vector.extract_strided_slice %12 {offsets = [16, 0], sizes = [8, 512], strides = [1, 1]} : vector<64x512xf32> to vector<8x512xf32>
    %cst_16 = arith.constant dense<0.000000e+00> : vector<8x512xf32>
    %55 = tpu.matmul %53, %13, %cst_16 {dimension_numbers = #tpu.dot_dimension_numbers<[1], [0], [0], [1], [0, 0, 1, 1], [], []>} : vector<8x128xf32>, vector<128x512xf32>, vector<8x512xf32> -> vector<8x512xf32>
    %56 = arith.addf %54, %55 : vector<8x512xf32>
    %57 = vector.extract_strided_slice %56 {offsets = [0, 0], sizes = [8, 384], strides = [1, 1]} : vector<8x512xf32> to vector<8x384xf32>
    %58 = arith.negf %57 : vector<8x384xf32>
    %59 = math.exp %58 : vector<8x384xf32>
    %cst_17 = arith.constant 1.000000e+00 : f32
    %60 = vector.broadcast %cst_17 : f32 to vector<8x384xf32>
    %61 = arith.addf %60, %59 : vector<8x384xf32>
    %62 = arith.divf %60, %61 : vector<8x384xf32>
    %63 = vector.extract_strided_slice %56 {offsets = [0, 384], sizes = [8, 128], strides = [1, 1]} : vector<8x512xf32> to vector<8x128xf32>
    %64 = math.tanh %63 : vector<8x128xf32>
    %65 = vector.extract_strided_slice %62 {offsets = [0, 0], sizes = [8, 128], strides = [1, 1]} : vector<8x384xf32> to vector<8x128xf32>
    %66 = vector.extract_strided_slice %62 {offsets = [0, 128], sizes = [8, 128], strides = [1, 1]} : vector<8x384xf32> to vector<8x128xf32>
    %67 = vector.extract_strided_slice %62 {offsets = [0, 256], sizes = [8, 128], strides = [1, 1]} : vector<8x384xf32> to vector<8x128xf32>
    %68 = arith.mulf %66, %51 : vector<8x128xf32>
    %69 = arith.mulf %65, %64 : vector<8x128xf32>
    %70 = arith.addf %68, %69 : vector<8x128xf32>
    %71 = math.tanh %70 : vector<8x128xf32>
    %72 = arith.mulf %67, %71 : vector<8x128xf32>
    %73 = vector.extract_strided_slice %12 {offsets = [24, 0], sizes = [8, 512], strides = [1, 1]} : vector<64x512xf32> to vector<8x512xf32>
    %cst_18 = arith.constant dense<0.000000e+00> : vector<8x512xf32>
    %74 = tpu.matmul %72, %13, %cst_18 {dimension_numbers = #tpu.dot_dimension_numbers<[1], [0], [0], [1], [0, 0, 1, 1], [], []>} : vector<8x128xf32>, vector<128x512xf32>, vector<8x512xf32> -> vector<8x512xf32>
    %75 = arith.addf %73, %74 : vector<8x512xf32>
    %76 = vector.extract_strided_slice %75 {offsets = [0, 0], sizes = [8, 384], strides = [1, 1]} : vector<8x512xf32> to vector<8x384xf32>
    %77 = arith.negf %76 : vector<8x384xf32>
    %78 = math.exp %77 : vector<8x384xf32>
    %cst_19 = arith.constant 1.000000e+00 : f32
    %79 = vector.broadcast %cst_19 : f32 to vector<8x384xf32>
    %80 = arith.addf %79, %78 : vector<8x384xf32>
    %81 = arith.divf %79, %80 : vector<8x384xf32>
    %82 = vector.extract_strided_slice %75 {offsets = [0, 384], sizes = [8, 128], strides = [1, 1]} : vector<8x512xf32> to vector<8x128xf32>
    %83 = math.tanh %82 : vector<8x128xf32>
    %84 = vector.extract_strided_slice %81 {offsets = [0, 0], sizes = [8, 128], strides = [1, 1]} : vector<8x384xf32> to vector<8x128xf32>
    %85 = vector.extract_strided_slice %81 {offsets = [0, 128], sizes = [8, 128], strides = [1, 1]} : vector<8x384xf32> to vector<8x128xf32>
    %86 = vector.extract_strided_slice %81 {offsets = [0, 256], sizes = [8, 128], strides = [1, 1]} : vector<8x384xf32> to vector<8x128xf32>
    %87 = arith.mulf %85, %70 : vector<8x128xf32>
    %88 = arith.mulf %84, %83 : vector<8x128xf32>
    %89 = arith.addf %87, %88 : vector<8x128xf32>
    %90 = math.tanh %89 : vector<8x128xf32>
    %91 = arith.mulf %86, %90 : vector<8x128xf32>
    %92 = vector.extract_strided_slice %12 {offsets = [32, 0], sizes = [8, 512], strides = [1, 1]} : vector<64x512xf32> to vector<8x512xf32>
    %cst_20 = arith.constant dense<0.000000e+00> : vector<8x512xf32>
    %93 = tpu.matmul %91, %13, %cst_20 {dimension_numbers = #tpu.dot_dimension_numbers<[1], [0], [0], [1], [0, 0, 1, 1], [], []>} : vector<8x128xf32>, vector<128x512xf32>, vector<8x512xf32> -> vector<8x512xf32>
    %94 = arith.addf %92, %93 : vector<8x512xf32>
    %95 = vector.extract_strided_slice %94 {offsets = [0, 0], sizes = [8, 384], strides = [1, 1]} : vector<8x512xf32> to vector<8x384xf32>
    %96 = arith.negf %95 : vector<8x384xf32>
    %97 = math.exp %96 : vector<8x384xf32>
    %cst_21 = arith.constant 1.000000e+00 : f32
    %98 = vector.broadcast %cst_21 : f32 to vector<8x384xf32>
    %99 = arith.addf %98, %97 : vector<8x384xf32>
    %100 = arith.divf %98, %99 : vector<8x384xf32>
    %101 = vector.extract_strided_slice %94 {offsets = [0, 384], sizes = [8, 128], strides = [1, 1]} : vector<8x512xf32> to vector<8x128xf32>
    %102 = math.tanh %101 : vector<8x128xf32>
    %103 = vector.extract_strided_slice %100 {offsets = [0, 0], sizes = [8, 128], strides = [1, 1]} : vector<8x384xf32> to vector<8x128xf32>
    %104 = vector.extract_strided_slice %100 {offsets = [0, 128], sizes = [8, 128], strides = [1, 1]} : vector<8x384xf32> to vector<8x128xf32>
    %105 = vector.extract_strided_slice %100 {offsets = [0, 256], sizes = [8, 128], strides = [1, 1]} : vector<8x384xf32> to vector<8x128xf32>
    %106 = arith.mulf %104, %89 : vector<8x128xf32>
    %107 = arith.mulf %103, %102 : vector<8x128xf32>
    %108 = arith.addf %106, %107 : vector<8x128xf32>
    %109 = math.tanh %108 : vector<8x128xf32>
    %110 = arith.mulf %105, %109 : vector<8x128xf32>
    %111 = vector.extract_strided_slice %12 {offsets = [40, 0], sizes = [8, 512], strides = [1, 1]} : vector<64x512xf32> to vector<8x512xf32>
    %cst_22 = arith.constant dense<0.000000e+00> : vector<8x512xf32>
    %112 = tpu.matmul %110, %13, %cst_22 {dimension_numbers = #tpu.dot_dimension_numbers<[1], [0], [0], [1], [0, 0, 1, 1], [], []>} : vector<8x128xf32>, vector<128x512xf32>, vector<8x512xf32> -> vector<8x512xf32>
    %113 = arith.addf %111, %112 : vector<8x512xf32>
    %114 = vector.extract_strided_slice %113 {offsets = [0, 0], sizes = [8, 384], strides = [1, 1]} : vector<8x512xf32> to vector<8x384xf32>
    %115 = arith.negf %114 : vector<8x384xf32>
    %116 = math.exp %115 : vector<8x384xf32>
    %cst_23 = arith.constant 1.000000e+00 : f32
    %117 = vector.broadcast %cst_23 : f32 to vector<8x384xf32>
    %118 = arith.addf %117, %116 : vector<8x384xf32>
    %119 = arith.divf %117, %118 : vector<8x384xf32>
    %120 = vector.extract_strided_slice %113 {offsets = [0, 384], sizes = [8, 128], strides = [1, 1]} : vector<8x512xf32> to vector<8x128xf32>
    %121 = math.tanh %120 : vector<8x128xf32>
    %122 = vector.extract_strided_slice %119 {offsets = [0, 0], sizes = [8, 128], strides = [1, 1]} : vector<8x384xf32> to vector<8x128xf32>
    %123 = vector.extract_strided_slice %119 {offsets = [0, 128], sizes = [8, 128], strides = [1, 1]} : vector<8x384xf32> to vector<8x128xf32>
    %124 = vector.extract_strided_slice %119 {offsets = [0, 256], sizes = [8, 128], strides = [1, 1]} : vector<8x384xf32> to vector<8x128xf32>
    %125 = arith.mulf %123, %108 : vector<8x128xf32>
    %126 = arith.mulf %122, %121 : vector<8x128xf32>
    %127 = arith.addf %125, %126 : vector<8x128xf32>
    %128 = math.tanh %127 : vector<8x128xf32>
    %129 = arith.mulf %124, %128 : vector<8x128xf32>
    %130 = vector.extract_strided_slice %12 {offsets = [48, 0], sizes = [8, 512], strides = [1, 1]} : vector<64x512xf32> to vector<8x512xf32>
    %cst_24 = arith.constant dense<0.000000e+00> : vector<8x512xf32>
    %131 = tpu.matmul %129, %13, %cst_24 {dimension_numbers = #tpu.dot_dimension_numbers<[1], [0], [0], [1], [0, 0, 1, 1], [], []>} : vector<8x128xf32>, vector<128x512xf32>, vector<8x512xf32> -> vector<8x512xf32>
    %132 = arith.addf %130, %131 : vector<8x512xf32>
    %133 = vector.extract_strided_slice %132 {offsets = [0, 0], sizes = [8, 384], strides = [1, 1]} : vector<8x512xf32> to vector<8x384xf32>
    %134 = arith.negf %133 : vector<8x384xf32>
    %135 = math.exp %134 : vector<8x384xf32>
    %cst_25 = arith.constant 1.000000e+00 : f32
    %136 = vector.broadcast %cst_25 : f32 to vector<8x384xf32>
    %137 = arith.addf %136, %135 : vector<8x384xf32>
    %138 = arith.divf %136, %137 : vector<8x384xf32>
    %139 = vector.extract_strided_slice %132 {offsets = [0, 384], sizes = [8, 128], strides = [1, 1]} : vector<8x512xf32> to vector<8x128xf32>
    %140 = math.tanh %139 : vector<8x128xf32>
    %141 = vector.extract_strided_slice %138 {offsets = [0, 0], sizes = [8, 128], strides = [1, 1]} : vector<8x384xf32> to vector<8x128xf32>
    %142 = vector.extract_strided_slice %138 {offsets = [0, 128], sizes = [8, 128], strides = [1, 1]} : vector<8x384xf32> to vector<8x128xf32>
    %143 = vector.extract_strided_slice %138 {offsets = [0, 256], sizes = [8, 128], strides = [1, 1]} : vector<8x384xf32> to vector<8x128xf32>
    %144 = arith.mulf %142, %127 : vector<8x128xf32>
    %145 = arith.mulf %141, %140 : vector<8x128xf32>
    %146 = arith.addf %144, %145 : vector<8x128xf32>
    %147 = math.tanh %146 : vector<8x128xf32>
    %148 = arith.mulf %143, %147 : vector<8x128xf32>
    %149 = vector.extract_strided_slice %12 {offsets = [56, 0], sizes = [8, 512], strides = [1, 1]} : vector<64x512xf32> to vector<8x512xf32>
    %cst_26 = arith.constant dense<0.000000e+00> : vector<8x512xf32>
    %150 = tpu.matmul %148, %13, %cst_26 {dimension_numbers = #tpu.dot_dimension_numbers<[1], [0], [0], [1], [0, 0, 1, 1], [], []>} : vector<8x128xf32>, vector<128x512xf32>, vector<8x512xf32> -> vector<8x512xf32>
    %151 = arith.addf %149, %150 : vector<8x512xf32>
    %152 = vector.extract_strided_slice %151 {offsets = [0, 0], sizes = [8, 384], strides = [1, 1]} : vector<8x512xf32> to vector<8x384xf32>
    %153 = arith.negf %152 : vector<8x384xf32>
    %154 = math.exp %153 : vector<8x384xf32>
    %cst_27 = arith.constant 1.000000e+00 : f32
    %155 = vector.broadcast %cst_27 : f32 to vector<8x384xf32>
    %156 = arith.addf %155, %154 : vector<8x384xf32>
    %157 = arith.divf %155, %156 : vector<8x384xf32>
    %158 = vector.extract_strided_slice %151 {offsets = [0, 384], sizes = [8, 128], strides = [1, 1]} : vector<8x512xf32> to vector<8x128xf32>
    %159 = math.tanh %158 : vector<8x128xf32>
    %160 = vector.extract_strided_slice %157 {offsets = [0, 0], sizes = [8, 128], strides = [1, 1]} : vector<8x384xf32> to vector<8x128xf32>
    %161 = vector.extract_strided_slice %157 {offsets = [0, 128], sizes = [8, 128], strides = [1, 1]} : vector<8x384xf32> to vector<8x128xf32>
    %162 = vector.extract_strided_slice %157 {offsets = [0, 256], sizes = [8, 128], strides = [1, 1]} : vector<8x384xf32> to vector<8x128xf32>
    %163 = arith.mulf %161, %146 : vector<8x128xf32>
    %164 = arith.mulf %160, %159 : vector<8x128xf32>
    %165 = arith.addf %163, %164 : vector<8x128xf32>
    %166 = math.tanh %165 : vector<8x128xf32>
    %167 = arith.mulf %162, %166 : vector<8x128xf32>
    %c0_28 = arith.constant 0 : index
    %c0_29 = arith.constant 0 : index
    %168 = vector.load %arg5[%c0_28, %c0_29] : memref<128x128xf32, #tpu.memory_space<vmem>>, vector<128x128xf32>
    %cst_30 = arith.constant dense<0.000000e+00> : vector<8x128xf32>
    %169 = tpu.matmul %167, %168, %cst_30 {dimension_numbers = #tpu.dot_dimension_numbers<[1], [0], [0], [1], [0, 0, 1, 1], [], []>} : vector<8x128xf32>, vector<128x128xf32>, vector<8x128xf32> -> vector<8x128xf32>
    %c0_31 = arith.constant 0 : index
    %c0_32 = arith.constant 0 : index
    %170 = vector.load %arg6[%c0_31, %c0_32] : memref<1x128xf32, #tpu.memory_space<vmem>>, vector<1x128xf32>
    %171 = vector.broadcast %170 : vector<1x128xf32> to vector<8x128xf32>
    %172 = arith.addf %169, %171 : vector<8x128xf32>
    %c0_33 = arith.constant 0 : index
    %c0_34 = arith.constant 0 : index
    %173 = vector.load %arg7[%c0_33, %c0_34] : memref<8x128xf32, #tpu.memory_space<vmem>>, vector<8x128xf32>
    tpu.vector_store %arg7[%c0_33, %c0_34], %172 {strides = array<i32>} : memref<8x128xf32, #tpu.memory_space<vmem>>, vector<8x128xf32>,
    return
  }
}

</mosaic_0001>

<bundles_post_ra>
// kernel: tpu_custom_call.1
= control target key start
LH: loop header
LB: loop body
LE: loop exit
PB: predicated region body
PF: predicated region fallthrough
CT: control target
= control target key end

     0   :  { %12 = vsyncpa [#allocation3], 0  ;;  %s4072_s0 = inlined_call_operand.vmem [shape: s32[64,1], index: 0, kind: input, shape index: {}]   ;;  %s4073_s1 = inlined_call_operand.vmem [shape: f32[128,16], index: 1, kind: input, shape index: {}]   ;;  %s4074_s2 = inlined_call_operand.vmem [shape: f32[16,512], index: 2, kind: input, shape index: {}]   ;;  %s4075_s3 = inlined_call_operand.hbm [shape: f32[128,512], index: 3, kind: input, shape index: {}]   ;;  %s4076_s4 = inlined_call_operand.vmem [shape: f32[1,512], index: 4, kind: input, shape index: {}]   ;;  %s4077_s5 = inlined_call_operand.vmem [shape: f32[128,128], index: 5, kind: input, shape index: {}]   ;;  %s4078_s6 = inlined_call_operand.vmem [shape: f32[1,128], index: 6, kind: input, shape index: {}]   ;;  %s4079_s7 = inlined_call_operand.hbm [shape: f32[8,128], index: 7, kind: output, shape index: {}]  }
   0x1   :  { %13 = vsyncpa [#allocation4], 0  ;;  %s2658_s24 = smov [#allocation2]  }
   0x2   :  { %s25_s25 = sshll.u32 %s2658_s24, 4  ;;  %s26_s25 = int_to_ptr.vmem [resolvable:$true] %s25_s25 }
   0x3   :  { %s2622_s26 = scalar_lea.vmem %s26_s25, 8192  ;;  %p2627_p1 = scmp.lt.s32.totalorder %s26_s25, %s26_s25 }
   0x4   :  { %p2623_p0 = scmp.ne.s32.totalorder %s26_s25, %s2622_s26  ;;  %p2628_p2 = scmp.lt.s32.totalorder %s2622_s26, %s2622_s26 }
   0x6   :  { %p2629_p3 = por %p2628_p2, %p2627_p1 }
   0x8   :  { %p2630_p4 = pnand %p2629_p3, %p2623_p0 }
   0xa   :  { %2633 = shalt.err (!%p2630_p4)
}
   0xb   :  { %s2659_s27 = smov 512   ;;  %s2660_s28 = smov 32  }
   0xc   :  { %31 = dma.hbm_to_vmem [thread:$0]  %s4075_s3, 8192, %s26_s25, [#allocation3], %s2659_s27, %s2659_s27, %s2660_s28  }
   0xd   :  { %2654 = dma.done.wait [#allocation3], 8192  }
   0xe   :  { %2655 = vsyncadd [#allocation3], 4294959104  ;;  %v4081_v0 = vmov 0.0   ;;  %v2662_v1 = vmov 0   ;;  %v62_v2 = vld [vmem:[%s4074_s2 + $0x28] sm:$0xff]  ;;  %v61_v3 = vld [vmem:[%s4074_s2 + $0x20] sm:$0xff] }
   0xf   :  { %178 = vmatprep.mubr.f32.mxu0 %v4081_v0  ;;  %250 = vmatprep.mubr.f32.mxu1 %v4081_v0  ;;  %v58_v4 = vld [vmem:[%s4074_s2 + $0x8] sm:$0xff]  ;;  %v57_v5 = vld [vmem:[%s4074_s2] sm:$0xff]  ;;  %vm65_vm0 = vcmask 130048   ;;  %v64_v8 = vld [vmem:[%s4074_s2 + $0x38] sm:$0xff]  ;;  %vm2664_vm9 = vmmov 0   ;;  %s2665_s25 = smov [#allocation5]  }
  0x10   :  { %2420 = vset.pattern.permute.xlu0 %v2662_v1  ;;  %2421 = vset.pattern.permute.xlu1 %v2662_v1  ;;  %v41_v6 = vld [vmem:[%s4073_s1] sm:$0xff]  ;;  %v63_v9 = vld [vmem:[%s4074_s2 + $0x30] sm:$0xff]  ;;  %v42_v10 = vld [vmem:[%s4073_s1 + $0x8] sm:$0xff]  ;;  %s2266_s26 = sshll.u32 %s2665_s25, 4  ;;  %s2267_s26 = int_to_ptr.vmem [resolvable:$true] %s2266_s26 }
  0x11   :  { %142 = vmatprep.subr.mxu0 %v62_v2  ;;  %2408 = vmatprep.subr.mxu1 %v62_v2  ;;  %v2729_v7 = vld [vmem:[%s4073_s1 + $0x60] sm:$0xff]  ;;  %v2748_v11 = vld [vmem:[%s4073_s1 + $0x68] sm:$0xff]  ;;  %v60_v12 = vld [vmem:[%s4074_s2 + $0x18] sm:$0xff]  ;;  %s2634_s27 = scalar_lea.vmem %s2267_s26, 128  ;;  %p2639_p6 = scmp.lt.s32.totalorder %s2267_s26, %s2267_s26 }
  0x12   :  { %143 = vmatpush1.msra.mxu0 %v61_v3  ;;  %2410 = vmatpush1.msra.mxu1 %v61_v3  ;;  %v436_v13 = vld [vmem:[%s4072_s0] sm:$0xff]  ;;  %v59_v14 = vld [vmem:[%s4074_s2 + $0x10] sm:$0xff]  ;;  %v437_v18 = vld [vmem:[%s4072_s0 + $0x8] sm:$0xff]  ;;  %p2635_p5 = scmp.ne.s32.totalorder %s2267_s26, %s2634_s27  ;;  %p2640_p7 = scmp.lt.s32.totalorder %s2634_s27, %s2634_s27 }
  0x13   :  { %144 = vmatprep.subr.mxu0 %v58_v4  ;;  %2409 = vmatprep.subr.mxu1 %v58_v4  ;;  %v438_v15 = vld [vmem:[%s4072_s0 + $0x10] sm:$0xff]  ;;  %v439_v19 = vld [vmem:[%s4072_s0 + $0x18] sm:$0xff]  ;;  %v440_v22 = vld [vmem:[%s4072_s0 + $0x20] sm:$0xff] }
  0x14   :  { %145 = vmatpush1.msra.mxu0 %v57_v5  ;;  %2411 = vmatpush1.msra.mxu1 %v57_v5  ;;  %v43_v16 = vld [vmem:[%s4073_s1 + $0x10] sm:$0xff]  ;;  %v44_v20 = vld [vmem:[%s4073_s1 + $0x18] sm:$0xff]  ;;  %v441_v23 = vld [vmem:[%s4072_s0 + $0x28] sm:$0xff]  ;;  %p2641_p8 = por %p2640_p7, %p2639_p6 }
  0x15   :  { %2275 = vmatmul.mubr.msk.f32.vlgmr.msra.gmra.mxu0 %vm65_vm0, %v41_v6  ;;  %2287 = vmatmul.mubr.msk.f32.vlgmr.msra.gmra.mxu1 %vm65_vm0, %v2729_v7  ;;  %v2773_v17 = vld [vmem:[%s4073_s1 + $0x70] sm:$0xff]  ;;  %v2792_v21 = vld [vmem:[%s4073_s1 + $0x78] sm:$0xff]  ;;  %v45_v24 = vld [vmem:[%s4073_s1 + $0x20] sm:$0xff] }
  0x16   :  { %184 = vmatprep.mubr.f32.mxu0 %v4081_v0  ;;  %256 = vmatprep.mubr.f32.mxu1 %v4081_v0  ;;  %v442_v25 = vld [vmem:[%s4072_s0 + $0x30] sm:$0xff]  ;;  %v443_v26 = vld [vmem:[%s4072_s0 + $0x38] sm:$0xff]  ;;  %v46_v27 = vld [vmem:[%s4073_s1 + $0x28] sm:$0xff]  ;;  %p2642_p9 = pnand %p2641_p8, %p2635_p5 }
  0x17   :  { %303 = vmatprep.subr.mxu1 %v64_v8  ;;  %447 = vperm.xlu0 %2420, %v436_v13   ;;  %v47_v28 = vld [vmem:[%s4073_s1 + $0x30] sm:$0xff]  ;;  %v48_v29 = vld [vmem:[%s4073_s1 + $0x38] sm:$0xff]  ;;  %v49_v30 = vld [vmem:[%s4073_s1 + $0x40] sm:$0xff] }
  0x18   :  { %304 = vmatpush1.msra.mxu1 %v63_v9  ;;  %453 = vperm.xlu1 %2421, %v438_v15   ;;  %v50_v31 = vld [vmem:[%s4073_s1 + $0x48] sm:$0xff]  ;;  %v51_v32 = vld [vmem:[%s4073_s1 + $0x50] sm:$0xff]  ;;  %v52_v33 = vld [vmem:[%s4073_s1 + $0x58] sm:$0xff] }
  0x19   :  { %2276 = vmatmul.mubr.msk.f32.gmra.mxu0 %vm65_vm0, %v42_v10  ;;  %2288 = vmatmul.mubr.msk.f32.gmra.mxu1 %vm65_vm0, %v2748_v11 }
  0x1a   :  { %190 = vmatprep.mubr.f32.mxu0 %v4081_v0  ;;  %262 = vmatprep.mubr.f32.mxu1 %v4081_v0 }
  0x1b   :  { %305 = vmatprep.subr.mxu1 %v60_v12  ;;  %450 = vperm.xlu0 %2420, %v437_v18  }
  0x1c   :  { %306 = vmatpush1.msra.mxu1 %v59_v14  ;;  %456 = vperm.xlu1 %2421, %v439_v19  }
  0x1d   :  { %2277 = vmatmul.mubr.msk.f32.gmra.mxu0 %vm65_vm0, %v43_v16  ;;  %2289 = vmatmul.mubr.msk.f32.gmra.mxu1 %vm65_vm0, %v2773_v17 }
  0x1e   :  { %196 = vmatprep.mubr.f32.mxu0 %v4081_v0  ;;  %268 = vmatprep.mubr.f32.mxu1 %v4081_v0 }
  0x1f   :  { %459 = vperm.xlu0 %2420, %v440_v22  }
  0x20   :  { %462 = vperm.xlu1 %2421, %v441_v23  }
  0x21   :  { %2278 = vmatmul.mubr.msk.f32.gmra.mxu0 %vm65_vm0, %v44_v20  ;;  %2290 = vmatmul.mubr.msk.f32.gmra.mxu1 %vm65_vm0, %v2792_v21 }
  0x22   :  { %202 = vmatprep.mubr.f32.mxu0 %v4081_v0  ;;  %339 = vmatprep.mubr.f32.mxu1 %v4081_v0 }
  0x23   :  { %465 = vperm.xlu0 %2420, %v442_v25  }
  0x24   :  { %468 = vperm.xlu1 %2421, %v443_v26   ;;  %v4080_v26 = vlaneseq }
  0x25   :  { %2279 = vmatmul.mubr.msk.f32.gmra.mxu0 %vm65_vm0, %v45_v24  ;;  %2291 = vmatmul.mubr.msk.f32.vlgmr.msra.gmra.mxu1 %vm65_vm0, %v41_v6 }
  0x26   :  { %208 = vmatprep.mubr.f32.mxu0 %v4081_v0  ;;  %345 = vmatprep.mubr.f32.mxu1 %v4081_v0 }
  0x29   :  { %2280 = vmatmul.mubr.msk.f32.gmra.mxu0 %vm65_vm0, %v46_v27  ;;  %2292 = vmatmul.mubr.msk.f32.gmra.mxu1 %vm65_vm0, %v42_v10 }
  0x2a   :  { %214 = vmatprep.mubr.f32.mxu0 %v4081_v0  ;;  %351 = vmatprep.mubr.f32.mxu1 %v4081_v0 }
  0x2d   :  { %2281 = vmatmul.mubr.msk.f32.gmra.mxu0 %vm65_vm0, %v47_v28  ;;  %2293 = vmatmul.mubr.msk.f32.gmra.mxu1 %vm65_vm0, %v43_v16 }
  0x2e   :  { %220 = vmatprep.mubr.f32.mxu0 %v4081_v0  ;;  %357 = vmatprep.mubr.f32.mxu1 %v4081_v0 }
  0x31   :  { %2282 = vmatmul.mubr.msk.f32.gmra.mxu0 %vm65_vm0, %v48_v29  ;;  %2294 = vmatmul.mubr.msk.f32.gmra.mxu1 %vm65_vm0, %v44_v20 }
  0x32   :  { %226 = vmatprep.mubr.f32.mxu0 %v4081_v0  ;;  %363 = vmatprep.mubr.f32.mxu1 %v4081_v0 }
  0x35   :  { %2283 = vmatmul.mubr.msk.f32.gmra.mxu0 %vm65_vm0, %v49_v30  ;;  %2295 = vmatmul.mubr.msk.f32.gmra.mxu1 %vm65_vm0, %v45_v24 }
  0x36   :  { %232 = vmatprep.mubr.f32.mxu0 %v4081_v0  ;;  %369 = vmatprep.mubr.f32.mxu1 %v4081_v0 }
  0x39   :  { %2284 = vmatmul.mubr.msk.f32.gmra.mxu0 %vm65_vm0, %v50_v31  ;;  %2296 = vmatmul.mubr.msk.f32.gmra.mxu1 %vm65_vm0, %v46_v27 }
  0x3a   :  { %238 = vmatprep.mubr.f32.mxu0 %v4081_v0  ;;  %375 = vmatprep.mubr.f32.mxu1 %v4081_v0 }
  0x3d   :  { %2285 = vmatmul.mubr.msk.f32.gmra.mxu0 %vm65_vm0, %v51_v32  ;;  %2297 = vmatmul.mubr.msk.f32.gmra.mxu1 %vm65_vm0, %v47_v28 }
  0x3e   :  { %244 = vmatprep.mubr.f32.mxu0 %v4081_v0  ;;  %381 = vmatprep.mubr.f32.mxu1 %v4081_v0 }
  0x41   :  { %2286 = vmatmul.mubr.msk.f32.gmra.mxu0 %vm65_vm0, %v52_v33  ;;  %2298 = vmatmul.mubr.msk.f32.gmra.mxu1 %vm65_vm0, %v48_v29 }
  0x42   :  { %387 = vmatprep.mubr.f32.mxu1 %v4081_v0  ;;  %580 = vmatprep.mubr.f32.mxu0 %v4081_v0 }
  0x45   :  { %2299 = vmatmul.mubr.msk.f32.gmra.mxu1 %vm65_vm0, %v49_v30  ;;  %v2958_v30 = vand.u32 127, %v4080_v26  ;;  %v3266_v26 = vld [vmem:[#allocation2 + $0x70] sm:$0xff] }
  0x46   :  { %393 = vmatprep.mubr.f32.mxu1 %v4081_v0  ;;  %4190 = vst [vmem:[#allocation26_spill] sm:$0xff] %v3266_v26 }
  0x49   :  { %2300 = vmatmul.mubr.msk.f32.gmra.mxu1 %vm65_vm0, %v50_v31 }
  0x4a   :  { %399 = vmatprep.mubr.f32.mxu1 %v4081_v0 }
  0x4d   :  { %2301 = vmatmul.mubr.msk.f32.gmra.mxu1 %vm65_vm0, %v51_v32 }
  0x4e   :  { %405 = vmatprep.mubr.f32.mxu1 %v4081_v0 }
  0x51   :  { %2302 = vmatmul.mubr.msk.f32.gmra.mxu1 %vm65_vm0, %v52_v33  ;;  %v2966_v33 = vld [vmem:[#allocation2 + $0x1e8] sm:$0xff] }
  0x52   :  { %411 = vmatprep.mubr.f32.mxu1 %v4081_v0  ;;  %4172 = vst [vmem:[#allocation8_spill] sm:$0xff] %v2966_v33 }
  0x55   :  { %2303 = vmatmul.mubr.msk.f32.gmra.mxu1 %vm65_vm0, %v2729_v7 }
  0x56   :  { %417 = vmatprep.mubr.f32.mxu1 %v4081_v0 }
  0x59   :  { %2304 = vmatmul.mubr.msk.f32.gmra.mxu1 %vm65_vm0, %v2748_v11 }
  0x5a   :  { %423 = vmatprep.mubr.f32.mxu1 %v4081_v0 }
  0x5d   :  { %2305 = vmatmul.mubr.msk.f32.gmra.mxu1 %vm65_vm0, %v2773_v17 }
  0x5e   :  { %429 = vmatprep.mubr.f32.mxu1 %v4081_v0 }
  0x61   :  { %2306 = vmatmul.mubr.msk.f32.gmra.mxu1 %vm65_vm0, %v2792_v21 }
  0x62   :  { %693 = vmatprep.mubr.f32.mxu1 %v4081_v0 }
  0x92   :  { %v2952_v28 = vpop.permute.xlu0 %447 }
  0x93   :  { %vm470_vm1 = vcmp.eq.s32.totalorder %v2958_v30, %v2952_v28  ;;  %v3206_v28 = vld [vmem:[#allocation2 + $0x138] sm:$0xff] }
  0xd5   :  { %v2887_v34 = vpop.f32.mrf.mxu0  ;;  %v252_v35 = vpop.f32.mrf.mxu1 }
  0xd7   :  { %v2889_v36 = vpop.f32.mrf.mxu0  ;;  %v254_v37 = vpop.f32.mrf.mxu1 }
  0xd9   :  { %v2891_v38 = vpop.f32.mrf.mxu0  ;;  %v258_v39 = vpop.f32.mrf.mxu1 }
  0xdb   :  { %v2893_v40 = vpop.f32.mrf.mxu0  ;;  %v260_v41 = vpop.f32.mrf.mxu1 }
  0xdd   :  { %v2895_v42 = vpop.f32.mrf.mxu0  ;;  %v264_v43 = vpop.f32.mrf.mxu1 }
  0xdf   :  { %v2897_v44 = vpop.f32.mrf.mxu0  ;;  %v266_v45 = vpop.f32.mrf.mxu1 }
  0xe1   :  { %v2899_v46 = vpop.f32.mrf.mxu0  ;;  %v270_v47 = vpop.f32.mrf.mxu1 }
  0xe3   :  { %v2901_v48 = vpop.f32.mrf.mxu0  ;;  %v272_v49 = vpop.f32.mrf.mxu1 }
  0xe4   :  { %516 = vmatprep.subr.mxu0 %v272_v49 }
  0xe5   :  { %v204_v50 = vpop.f32.mrf.mxu0  ;;  %v2903_v51 = vpop.f32.mrf.mxu1  ;;  %517 = vmatpush1.msra.mxu0 %v270_v47 }
  0xe6   :  { %518 = vmatprep.subr.mxu0 %v266_v45  ;;  %v2995_v45 = vld [vmem:[#allocation2 + $0x188] sm:$0xff] }
  0xe7   :  { %v206_v52 = vpop.f32.mrf.mxu0  ;;  %v2905_v53 = vpop.f32.mrf.mxu1  ;;  %519 = vmatpush1.msra.mxu0 %v264_v43  ;;  %4176 = vst [vmem:[#allocation12_spill] sm:$0xff] %v2995_v45 }
  0xe8   :  { %520 = vmatprep.subr.mxu0 %v260_v41  ;;  %v2974_v41 = vld [vmem:[#allocation2 + $0x1c8] sm:$0xff]  ;;  %v2992_v43 = vpop.permute.xlu1 %453 }
  0xe9   :  { %v210_v54 = vpop.f32.mrf.mxu0  ;;  %v2907_v55 = vpop.f32.mrf.mxu1  ;;  %521 = vmatpush1.msra.mxu0 %v258_v39  ;;  %vm472_vm3 = vcmp.eq.s32.totalorder %v2958_v30, %v2992_v43  ;;  %v3240_v43 = vld [vmem:[#allocation2 + $0xd0] sm:$0xff] }
  0xea   :  { %522 = vmatprep.subr.mxu0 %v254_v37  ;;  %v2971_v37 = vpop.permute.xlu0 %450 }
  0xeb   :  { %v212_v56 = vpop.f32.mrf.mxu0  ;;  %v2909_v57 = vpop.f32.mrf.mxu1  ;;  %523 = vmatpush1.msra.mxu0 %v252_v35  ;;  %v2969_v35 = vld [vmem:[#allocation2 + $0x1e0] sm:$0xff]  ;;  %vm471_vm2 = vcmp.eq.s32.totalorder %v2958_v30, %v2971_v37  ;;  %v3225_v37 = vld [vmem:[#allocation2 + $0xf8] sm:$0xff] }
  0xed   :  { %v216_v58 = vpop.f32.mrf.mxu0  ;;  %v2911_v59 = vpop.f32.mrf.mxu1 }
  0xef   :  { %v218_v60 = vpop.f32.mrf.mxu0  ;;  %v2913_v61 = vpop.f32.mrf.mxu1 }
  0xf1   :  { %v222_v62 = vpop.f32.mrf.mxu0  ;;  %v2915_v63 = vpop.f32.mrf.mxu1 }
  0xf3   :  { %v224_v1 = vpop.f32.mrf.mxu0  ;;  %v2917_v2 = vpop.f32.mrf.mxu1 }
  0xf5   :  { %v228_v3 = vpop.f32.mrf.mxu0  ;;  %v2919_v4 = vpop.f32.mrf.mxu1 }
  0xf7   :  { %v230_v5 = vpop.f32.mrf.mxu0  ;;  %v2921_v6 = vpop.f32.mrf.mxu1 }
  0xf9   :  { %v234_v7 = vpop.f32.mrf.mxu0  ;;  %v2923_v8 = vpop.f32.mrf.mxu1 }
  0xfb   :  { %v236_v9 = vpop.f32.mrf.mxu0  ;;  %v2925_v10 = vpop.f32.mrf.mxu1 }
  0xfd   :  { %v240_v11 = vpop.f32.mrf.mxu0  ;;  %v2927_v12 = vpop.f32.mrf.mxu1 }
  0xff   :  { %v242_v13 = vpop.f32.mrf.mxu0  ;;  %v2929_v14 = vpop.f32.mrf.mxu1 }
 0x101   :  { %v246_v15 = vpop.f32.mrf.mxu0  ;;  %v2931_v16 = vpop.f32.mrf.mxu1 }
 0x103   :  { %v248_v17 = vpop.f32.mrf.mxu0  ;;  %v2933_v18 = vpop.f32.mrf.mxu1 }
 0x104   :  { %524 = vmatprep.subr.mxu0 %v248_v17  ;;  %v3086_v17 = vld [vmem:[#allocation2 + $0xa0] sm:$0xff] }
 0x105   :  { %v2935_v19 = vpop.f32.mrf.mxu1  ;;  %525 = vmatpush1.msra.mxu0 %v246_v15  ;;  %v3082_v15 = vld [vmem:[#allocation2 + $0xa8] sm:$0xff] }
 0x106   :  { %526 = vmatprep.subr.mxu0 %v242_v13  ;;  %v3074_v13 = vld [vmem:[#allocation2 + $0xc0] sm:$0xff] }
 0x107   :  { %v2937_v20 = vpop.f32.mrf.mxu1  ;;  %527 = vmatpush1.msra.mxu0 %v240_v11  ;;  %v3068_v11 = vld [vmem:[#allocation2 + $0xc8] sm:$0xff] }
 0x108   :  { %528 = vmatprep.subr.mxu0 %v236_v9 }
 0x109   :  { %v2939_v21 = vpop.f32.mrf.mxu1  ;;  %529 = vmatpush1.msra.mxu0 %v234_v7  ;;  %v3059_v7 = vld [vmem:[#allocation2 + $0xe0] sm:$0xff] }
 0x10a   :  { %530 = vmatprep.subr.mxu0 %v230_v5  ;;  %v3055_v5 = vld [vmem:[#allocation2 + $0xe8] sm:$0xff] }
 0x10b   :  { %v2941_v22 = vpop.f32.mrf.mxu1  ;;  %531 = vmatpush1.msra.mxu0 %v228_v3  ;;  %v3047_v3 = vld [vmem:[#allocation2 + $0x100] sm:$0xff] }
 0x10c   :  { %532 = vmatprep.subr.mxu0 %v224_v1  ;;  %v3041_v1 = vld [vmem:[#allocation2 + $0x108] sm:$0xff] }
 0x10d   :  { %v2943_v23 = vpop.f32.mrf.mxu1  ;;  %533 = vmatpush1.msra.mxu0 %v222_v62  ;;  %v3039_v62 = vpop.permute.xlu0 %459 }
 0x10e   :  { %534 = vmatprep.subr.mxu0 %v218_v60  ;;  %v3033_v60 = vld [vmem:[#allocation2 + $0x120] sm:$0xff]  ;;  %vm474_vm5 = vcmp.eq.s32.totalorder %v2958_v30, %v3039_v62  ;;  %v3263_v62 = vld [vmem:[#allocation2 + $0x78] sm:$0xff] }
 0x10f   :  { %v2945_v24 = vpop.f32.mrf.mxu1  ;;  %535 = vmatpush1.msra.mxu0 %v216_v58  ;;  %v3030_v58 = vld [vmem:[#allocation2 + $0x128] sm:$0xff]  ;;  %4189 = vst [vmem:[#allocation25_spill] sm:$0xff] %v3263_v62 }
 0x110   :  { %536 = vmatprep.subr.mxu0 %v212_v56  ;;  %v3024_v56 = vld [vmem:[#allocation2 + $0x140] sm:$0xff] }
 0x111   :  { %v2947_v25 = vpop.f32.mrf.mxu1  ;;  %537 = vmatpush1.msra.mxu0 %v210_v54  ;;  %v3020_v54 = vld [vmem:[#allocation2 + $0x148] sm:$0xff] }
 0x112   :  { %538 = vmatprep.subr.mxu0 %v206_v52  ;;  %v3018_v52 = vpop.permute.xlu1 %456 }
 0x113   :  { %v2949_v27 = vpop.f32.mrf.mxu1  ;;  %539 = vmatpush1.msra.mxu0 %v204_v50  ;;  %v3012_v50 = vld [vmem:[#allocation2 + $0x160] sm:$0xff]  ;;  %vm473_vm4 = vcmp.eq.s32.totalorder %v2958_v30, %v3018_v52  ;;  %v3259_v52 = vld [vmem:[#allocation2 + $0x90] sm:$0xff] }
 0x114   :  { %540 = vmatprep.subr.mxu0 %v2901_v48  ;;  %v3009_v48 = vld [vmem:[#allocation2 + $0x168] sm:$0xff]  ;;  %4188 = vst [vmem:[#allocation24_spill] sm:$0xff] %v3259_v52 }
 0x115   :  { %v2954_v29 = vpop.f32.mrf.mxu1  ;;  %541 = vmatpush1.msra.mxu0 %v2899_v46  ;;  %v3002_v46 = vld [vmem:[#allocation2 + $0x180] sm:$0xff] }
 0x116   :  { %542 = vmatprep.subr.mxu0 %v2897_v44  ;;  %v3066_v9 = vpop.permute.xlu1 %462 }
 0x117   :  { %v415_v31 = vpop.f32.mrf.mxu1  ;;  %543 = vmatpush1.msra.mxu0 %v2895_v42  ;;  %v2990_v42 = vld [vmem:[#allocation2 + $0x1a0] sm:$0xff]  ;;  %vm475_vm6 = vcmp.eq.s32.totalorder %v2958_v30, %v3066_v9  ;;  %v3270_v9 = vld [vmem:[#allocation2 + $0x58] sm:$0xff] }
 0x118   :  { %544 = vmatprep.subr.mxu0 %v2893_v40  ;;  %v2663_v40 = vmov 1.0   ;;  %4175 = vst [vmem:[#allocation11_spill] sm:$0xff] %v2990_v42  ;;  %4191 = vst [vmem:[#allocation27_spill] sm:$0xff] %v3270_v9 }
 0x119   :  { %v419_v32 = vpop.f32.mrf.mxu1  ;;  %545 = vmatpush1.msra.mxu0 %v2891_v38  ;;  %v2981_v38 = vld [vmem:[#allocation2 + $0x1c0] sm:$0xff] }
 0x11a   :  { %546 = vmatprep.subr.mxu0 %v2889_v36  ;;  %4173 = vst [vmem:[#allocation9_spill] sm:$0xff] %v2981_v38 }
 0x11b   :  { %v421_v39 = vpop.f32.mrf.mxu1  ;;  %547 = vmatpush1.msra.mxu0 %v2887_v34  ;;  %v2987_v34 = vld [vmem:[#allocation2 + $0x1a8] sm:$0xff] }
 0x11c   :  { %2315 = vmatmul.mubr.msk.f32.vlgmr.msra.gmra.mxu0 %vm470_vm1, %v2663_v40  ;;  %806 = vmatprep.subr.mxu0 %v2966_v33  ;;  %4174 = vst [vmem:[#allocation10_spill] sm:$0xff] %v2987_v34 }
 0x11d   :  { %v425_v36 = vpop.f32.mrf.mxu1  ;;  %807 = vmatpush1.msra.mxu0 %v2969_v35  ;;  %586 = vmatprep.mubr.f32.mxu0 %v4081_v0 }
 0x11e   :  { %808 = vmatprep.subr.mxu0 %v2974_v41 }
 0x11f   :  { %v427_v44 = vpop.f32.mrf.mxu1  ;;  %809 = vmatpush1.msra.mxu0 %v2981_v38 }
 0x120   :  { %2316 = vmatmul.mubr.msk.f32.gmra.mxu0 %vm471_vm2, %v2663_v40  ;;  %810 = vmatprep.subr.mxu0 %v2987_v34 }
 0x121   :  { %v431_v47 = vpop.f32.mrf.mxu1  ;;  %811 = vmatpush1.msra.mxu0 %v2990_v42  ;;  %592 = vmatprep.mubr.f32.mxu0 %v4081_v0 }
 0x122   :  { %812 = vmatprep.subr.mxu0 %v2995_v45 }
 0x123   :  { %v433_v49 = vpop.f32.mrf.mxu1  ;;  %813 = vmatpush1.msra.mxu0 %v3002_v46 }
 0x124   :  { %629 = vmatprep.subr.mxu1 %v433_v49  ;;  %2317 = vmatmul.mubr.msk.f32.gmra.mxu0 %vm472_vm3, %v2663_v40  ;;  %v3251_v49 = vld [vmem:[#allocation2 + $0x98] sm:$0xff] }
 0x125   :  { %630 = vmatpush1.msra.mxu1 %v431_v47  ;;  %814 = vmatprep.subr.mxu0 %v3009_v48  ;;  %v3247_v47 = vld [vmem:[#allocation2 + $0xb0] sm:$0xff]  ;;  %4187 = vst [vmem:[#allocation23_spill] sm:$0xff] %v3251_v49 }
 0x126   :  { %631 = vmatprep.subr.mxu1 %v427_v44  ;;  %815 = vmatpush1.msra.mxu0 %v3012_v50  ;;  %v3244_v44 = vld [vmem:[#allocation2 + $0xb8] sm:$0xff] }
 0x127   :  { %632 = vmatpush1.msra.mxu1 %v425_v36  ;;  %816 = vmatprep.subr.mxu0 %v3020_v54  ;;  %v3232_v36 = vld [vmem:[#allocation2 + $0xd8] sm:$0xff] }
 0x128   :  { %633 = vmatprep.subr.mxu1 %v421_v39  ;;  %598 = vmatprep.mubr.f32.mxu0 %v4081_v0  ;;  %v3228_v39 = vld [vmem:[#allocation2 + $0xf0] sm:$0xff] }
 0x129   :  { %634 = vmatpush1.msra.mxu1 %v419_v32  ;;  %817 = vmatpush1.msra.mxu0 %v3024_v56  ;;  %v3221_v32 = vld [vmem:[#allocation2 + $0x110] sm:$0xff] }
 0x12a   :  { %635 = vmatprep.subr.mxu1 %v415_v31  ;;  %2318 = vmatmul.mubr.msk.f32.gmra.mxu0 %vm473_vm4, %v2663_v40  ;;  %v3213_v31 = vld [vmem:[#allocation2 + $0x118] sm:$0xff] }
 0x12b   :  { %636 = vmatpush1.msra.mxu1 %v2954_v29  ;;  %818 = vmatprep.subr.mxu0 %v3030_v58  ;;  %v3209_v29 = vld [vmem:[#allocation2 + $0x130] sm:$0xff] }
 0x12c   :  { %637 = vmatprep.subr.mxu1 %v2949_v27  ;;  %819 = vmatpush1.msra.mxu0 %v3033_v60  ;;  %v3202_v27 = vld [vmem:[#allocation2 + $0x150] sm:$0xff] }
 0x12d   :  { %638 = vmatpush1.msra.mxu1 %v2947_v25  ;;  %820 = vmatprep.subr.mxu0 %v3041_v1  ;;  %v3194_v25 = vld [vmem:[#allocation2 + $0x158] sm:$0xff] }
 0x12e   :  { %639 = vmatprep.subr.mxu1 %v2945_v24  ;;  %604 = vmatprep.mubr.f32.mxu0 %v4081_v0  ;;  %v3190_v24 = vld [vmem:[#allocation2 + $0x170] sm:$0xff] }
 0x12f   :  { %640 = vmatpush1.msra.mxu1 %v2943_v23  ;;  %821 = vmatpush1.msra.mxu0 %v3047_v3  ;;  %v3187_v23 = vld [vmem:[#allocation2 + $0x178] sm:$0xff] }
 0x130   :  { %641 = vmatprep.subr.mxu1 %v2941_v22  ;;  %2319 = vmatmul.mubr.msk.f32.gmra.mxu0 %vm474_vm5, %v2663_v40  ;;  %v3183_v22 = vld [vmem:[#allocation2 + $0x190] sm:$0xff] }
 0x131   :  { %642 = vmatpush1.msra.mxu1 %v2939_v21  ;;  %822 = vmatprep.subr.mxu0 %v3055_v5  ;;  %v3176_v21 = vld [vmem:[#allocation2] sm:$0xff] }
 0x132   :  { %643 = vmatprep.subr.mxu1 %v2937_v20  ;;  %823 = vmatpush1.msra.mxu0 %v3059_v7  ;;  %v3173_v20 = vld [vmem:[#allocation2 + $0x198] sm:$0xff]  ;;  %4186 = vst [vmem:[#allocation22_spill] sm:$0xff] %v3176_v21 }
 0x133   :  { %644 = vmatpush1.msra.mxu1 %v2935_v19  ;;  %824 = vmatprep.subr.mxu0 %v3068_v11  ;;  %v3093_v19 = vld [vmem:[#allocation2 + $0x88] sm:$0xff] }
 0x134   :  { %645 = vmatprep.subr.mxu1 %v2933_v18  ;;  %610 = vmatprep.mubr.f32.mxu0 %v4081_v0  ;;  %v3101_v18 = vld [vmem:[#allocation2 + $0x80] sm:$0xff] }
 0x135   :  { %646 = vmatpush1.msra.mxu1 %v2931_v16  ;;  %825 = vmatpush1.msra.mxu0 %v3074_v13  ;;  %v3099_v16 = vpop.permute.xlu0 %465  ;;  %4177 = vst [vmem:[#allocation13_spill] sm:$0xff] %v3101_v18 }
 0x136   :  { %647 = vmatprep.subr.mxu1 %v2929_v14  ;;  %2320 = vmatmul.mubr.msk.f32.gmra.mxu0 %vm475_vm6, %v2663_v40  ;;  %v3107_v14 = vld [vmem:[#allocation2 + $0x68] sm:$0xff]  ;;  %vm476_vm7 = vcmp.eq.s32.totalorder %v2958_v30, %v3099_v16  ;;  %v3289_v16 = vld [vmem:[#allocation2 + $0x18] sm:$0xff] }
 0x137   :  { %648 = vmatpush1.msra.mxu1 %v2927_v12  ;;  %826 = vmatprep.subr.mxu0 %v3082_v15  ;;  %4178 = vst [vmem:[#allocation14_spill] sm:$0xff] %v3107_v14  ;;  %v3169_v12 = vld [vmem:[#allocation2 + $0x1b0] sm:$0xff]  ;;  %4196 = vst [vmem:[#allocation31_spill] sm:$0xff] %v3289_v16 }
 0x138   :  { %649 = vmatprep.subr.mxu1 %v2925_v10  ;;  %827 = vmatpush1.msra.mxu0 %v3086_v17  ;;  %v3113_v10 = vld [vmem:[#allocation2 + $0x60] sm:$0xff] }
 0x139   :  { %650 = vmatpush1.msra.mxu1 %v2923_v8  ;;  %828 = vmatprep.subr.mxu0 %v3093_v19  ;;  %4179 = vst [vmem:[#allocation15_spill] sm:$0xff] %v3113_v10  ;;  %v3122_v8 = vld [vmem:[#allocation2 + $0x48] sm:$0xff] }
 0x13a   :  { %651 = vmatprep.subr.mxu1 %v2921_v6  ;;  %616 = vmatprep.mubr.f32.mxu0 %v4081_v0  ;;  %v3120_v6 = vpop.permute.xlu1 %468  ;;  %4180 = vst [vmem:[#allocation16_spill] sm:$0xff] %v3122_v8 }
 0x13b   :  { %652 = vmatpush1.msra.mxu1 %v2919_v4  ;;  %829 = vmatpush1.msra.mxu0 %v3101_v18  ;;  %v3128_v4 = vld [vmem:[#allocation2 + $0x40] sm:$0xff]  ;;  %vm477_vm8 = vcmp.eq.s32.totalorder %v2958_v30, %v3120_v6  ;;  %v4198_v30 = vlaneseq }
 0x13c   :  { %653 = vmatprep.subr.mxu1 %v2917_v2  ;;  %2321 = vmatmul.mubr.msk.f32.gmra.mxu0 %vm476_vm7, %v2663_v40  ;;  %4181 = vst [vmem:[#allocation17_spill] sm:$0xff] %v3128_v4  ;;  %v3162_v2 = vld [vmem:[#allocation2 + $0x8] sm:$0xff] }
 0x13d   :  { %654 = vmatpush1.msra.mxu1 %v2915_v63  ;;  %830 = vmatprep.subr.mxu0 %v3107_v14  ;;  %v3136_v63 = vld [vmem:[#allocation2 + $0x28] sm:$0xff]  ;;  %4185 = vst [vmem:[#allocation21_spill] sm:$0xff] %v3162_v2 }
 0x13e   :  { %655 = vmatprep.subr.mxu1 %v2913_v61  ;;  %831 = vmatpush1.msra.mxu0 %v3113_v10  ;;  %4182 = vst [vmem:[#allocation18_spill] sm:$0xff] %v3136_v63  ;;  %v3139_v61 = vld [vmem:[#allocation2 + $0x1f8] sm:$0xff] }
 0x13f   :  { %656 = vmatpush1.msra.mxu1 %v2911_v59  ;;  %832 = vmatprep.subr.mxu0 %v3122_v8  ;;  %4183 = vst [vmem:[#allocation19_spill] sm:$0xff] %v3139_v61  ;;  %v3143_v59 = vld [vmem:[#allocation2 + $0x1f0] sm:$0xff] }
 0x140   :  { %657 = vmatprep.subr.mxu1 %v2909_v57  ;;  %622 = vmatprep.mubr.f32.mxu0 %v4081_v0  ;;  %v3150_v57 = vld [vmem:[#allocation2 + $0x1d8] sm:$0xff] }
 0x141   :  { %658 = vmatpush1.msra.mxu1 %v2907_v55  ;;  %833 = vmatpush1.msra.mxu0 %v3128_v4  ;;  %v3153_v55 = vld [vmem:[#allocation2 + $0x20] sm:$0xff] }
 0x142   :  { %659 = vmatprep.subr.mxu1 %v2905_v53  ;;  %2322 = vmatmul.mubr.msk.f32.gmra.mxu0 %vm477_vm8, %v2663_v40  ;;  %4184 = vst [vmem:[#allocation20_spill] sm:$0xff] %v3153_v55  ;;  %v3160_v53 = vld [vmem:[#allocation2 + $0x1d0] sm:$0xff] }
 0x143   :  { %660 = vmatpush1.msra.mxu1 %v2903_v51  ;;  %834 = vmatprep.subr.mxu0 %v3136_v63  ;;  %v3166_v51 = vld [vmem:[#allocation2 + $0x1b8] sm:$0xff] }
 0x144   :  { %2323 = vmatmul.mubr.msk.f32.vlgmr.msra.gmra.mxu1 %vm470_vm1, %v2663_v40  ;;  %877 = vmatprep.subr.mxu1 %v3139_v61 }
 0x145   :  { %878 = vmatpush1.msra.mxu1 %v3143_v59  ;;  %699 = vmatprep.mubr.f32.mxu1 %v4081_v0 }
 0x146   :  { %879 = vmatprep.subr.mxu1 %v3150_v57  ;;  %835 = vmatpush1.msra.mxu0 %v3153_v55 }
 0x147   :  { %880 = vmatpush1.msra.mxu1 %v3160_v53  ;;  %836 = vmatprep.subr.mxu0 %v3162_v2 }
 0x148   :  { %2324 = vmatmul.mubr.msk.f32.gmra.mxu1 %vm471_vm2, %v2663_v40  ;;  %881 = vmatprep.subr.mxu1 %v3166_v51 }
 0x149   :  { %882 = vmatpush1.msra.mxu1 %v3169_v12  ;;  %705 = vmatprep.mubr.f32.mxu1 %v4081_v0 }
 0x14a   :  { %883 = vmatprep.subr.mxu1 %v3173_v20  ;;  %837 = vmatpush1.msra.mxu0 %v3176_v21 }
 0x14b   :  { %884 = vmatpush1.msra.mxu1 %v3183_v22  ;;  %870 = vmatprep.mubr.f32.mxu0 %v4081_v0 }
 0x14c   :  { %2325 = vmatmul.mubr.msk.f32.gmra.mxu1 %vm472_vm3, %v2663_v40  ;;  %885 = vmatprep.subr.mxu1 %v3187_v23 }
 0x14d   :  { %886 = vmatpush1.msra.mxu1 %v3190_v24  ;;  %711 = vmatprep.mubr.f32.mxu1 %v4081_v0 }
 0x14e   :  { %887 = vmatprep.subr.mxu1 %v3194_v25  ;;  %871 = vmatmul.mubr.f32.vlgmr.msra.gmra.mxu0 %v4081_v0 }
 0x14f   :  { %888 = vmatpush1.msra.mxu1 %v3202_v27  ;;  %976 = vmatprep.subr.mxu0 %v2966_v33 }
 0x150   :  { %2326 = vmatmul.mubr.msk.f32.gmra.mxu1 %vm473_vm4, %v2663_v40  ;;  %889 = vmatprep.subr.mxu1 %v3206_v28 }
 0x151   :  { %890 = vmatpush1.msra.mxu1 %v3209_v29  ;;  %717 = vmatprep.mubr.f32.mxu1 %v4081_v0 }
 0x152   :  { %891 = vmatprep.subr.mxu1 %v3213_v31  ;;  %977 = vmatpush1.msra.mxu0 %v2969_v35 }
 0x153   :  { %892 = vmatpush1.msra.mxu1 %v3221_v32  ;;  %978 = vmatprep.subr.mxu0 %v2974_v41 }
 0x154   :  { %2327 = vmatmul.mubr.msk.f32.gmra.mxu1 %vm474_vm5, %v2663_v40  ;;  %893 = vmatprep.subr.mxu1 %v3225_v37 }
 0x155   :  { %894 = vmatpush1.msra.mxu1 %v3228_v39  ;;  %723 = vmatprep.mubr.f32.mxu1 %v4081_v0 }
 0x156   :  { %895 = vmatprep.subr.mxu1 %v3232_v36  ;;  %979 = vmatpush1.msra.mxu0 %v2981_v38  ;;  %v3285_v38 = vld [vmem:[#allocation2 + $0x30] sm:$0xff] }
 0x157   :  { %896 = vmatpush1.msra.mxu1 %v3240_v43  ;;  %980 = vmatprep.subr.mxu0 %v2987_v34  ;;  %v4193_v34 = vmov 0.0   ;;  %4195 = vst [vmem:[#allocation30_spill] sm:$0xff] %v3285_v38 }
 0x158   :  { %2328 = vmatmul.mubr.msk.f32.gmra.mxu1 %vm475_vm6, %v2663_v40  ;;  %897 = vmatprep.subr.mxu1 %v3244_v44 }
 0x159   :  { %898 = vmatpush1.msra.mxu1 %v3247_v47  ;;  %729 = vmatprep.mubr.f32.mxu1 %v4081_v0  ;;  %v3278_v0 = vld [vmem:[#allocation2 + $0x50] sm:$0xff] }
 0x15a   :  { %899 = vmatprep.subr.mxu1 %v3251_v49  ;;  %981 = vmatpush1.msra.mxu0 %v2990_v42  ;;  %4192 = vst [vmem:[#allocation28_spill] sm:$0xff] %v3278_v0  ;;  %v3282_v42 = vld [vmem:[#allocation2 + $0x38] sm:$0xff] }
 0x15b   :  { %900 = vmatpush1.msra.mxu1 %v3259_v52  ;;  %982 = vmatprep.subr.mxu0 %v2995_v45  ;;  %4194 = vst [vmem:[#allocation29_spill] sm:$0xff] %v3282_v42  ;;  %v3297_v45 = vld [vmem:[#allocation2 + $0x10] sm:$0xff] }
 0x15c   :  { %2329 = vmatmul.mubr.msk.f32.gmra.mxu1 %vm476_vm7, %v2663_v40  ;;  %901 = vmatprep.subr.mxu1 %v3263_v62  ;;  %4197 = vst [vmem:[#allocation32_spill] sm:$0xff] %v3297_v45 }
 0x15d   :  { %902 = vmatpush1.msra.mxu1 %v3266_v26  ;;  %735 = vmatprep.mubr.f32.mxu1 %v4193_v34 }
 0x15e   :  { %903 = vmatprep.subr.mxu1 %v3270_v9  ;;  %983 = vmatpush1.msra.mxu0 %v3002_v46 }
 0x15f   :  { %904 = vmatpush1.msra.mxu1 %v3278_v0  ;;  %984 = vmatprep.subr.mxu0 %v3009_v48 }
 0x160   :  { %2330 = vmatmul.mubr.msk.f32.gmra.mxu1 %vm477_vm8, %v2663_v40  ;;  %905 = vmatprep.subr.mxu1 %v3282_v42  ;;  %v497_v40 = vshrl.u32 %v4198_v30, 7 }
 0x161   :  { %906 = vmatpush1.msra.mxu1 %v3285_v38  ;;  %941 = vmatprep.mubr.f32.mxu1 %v4193_v34 }
 0x162   :  { %907 = vmatprep.subr.mxu1 %v3289_v16  ;;  %985 = vmatpush1.msra.mxu0 %v3012_v50  ;;  %v498_v6 = vsub.s32 0, %v497_v40 }
 0x163   :  { %908 = vmatpush1.msra.mxu1 %v3297_v45  ;;  %986 = vmatprep.subr.mxu0 %v3020_v54 }
 0x164   :  { %942 = vmatmul.mubr.f32.vlgmr.msra.gmra.mxu1 %v4193_v34  ;;  %1047 = vmatprep.subr.mxu1 %v3139_v61 }
 0x165   :  { %1048 = vmatpush1.msra.mxu1 %v3143_v59  ;;  %987 = vmatpush1.msra.mxu0 %v3024_v56 }
 0x166   :  { %1049 = vmatprep.subr.mxu1 %v3150_v57  ;;  %988 = vmatprep.subr.mxu0 %v3030_v58 }
 0x167   :  { %1050 = vmatpush1.msra.mxu1 %v3160_v53  ;;  %989 = vmatpush1.msra.mxu0 %v3033_v60 }
 0x168   :  { %1051 = vmatprep.subr.mxu1 %v3166_v51  ;;  %990 = vmatprep.subr.mxu0 %v3041_v1 }
 0x169   :  { %1052 = vmatpush1.msra.mxu1 %v3169_v12  ;;  %991 = vmatpush1.msra.mxu0 %v3047_v3 }
 0x16a   :  { %1053 = vmatprep.subr.mxu1 %v3173_v20  ;;  %992 = vmatprep.subr.mxu0 %v3055_v5 }
 0x16b   :  { %1054 = vmatpush1.msra.mxu1 %v3183_v22  ;;  %993 = vmatpush1.msra.mxu0 %v3059_v7 }
 0x16c   :  { %1055 = vmatprep.subr.mxu1 %v3187_v23  ;;  %994 = vmatprep.subr.mxu0 %v3068_v11 }
 0x16d   :  { %1056 = vmatpush1.msra.mxu1 %v3190_v24  ;;  %995 = vmatpush1.msra.mxu0 %v3074_v13 }
 0x16e   :  { %1057 = vmatprep.subr.mxu1 %v3194_v25  ;;  %996 = vmatprep.subr.mxu0 %v3082_v15 }
 0x16f   :  { %1058 = vmatpush1.msra.mxu1 %v3202_v27  ;;  %997 = vmatpush1.msra.mxu0 %v3086_v17 }
 0x170   :  { %1059 = vmatprep.subr.mxu1 %v3206_v28  ;;  %998 = vmatprep.subr.mxu0 %v3093_v19 }
 0x171   :  { %1060 = vmatpush1.msra.mxu1 %v3209_v29  ;;  %999 = vmatpush1.msra.mxu0 %v3101_v18 }
 0x172   :  { %1061 = vmatprep.subr.mxu1 %v3213_v31  ;;  %1000 = vmatprep.subr.mxu0 %v3107_v14 }
 0x173   :  { %1062 = vmatpush1.msra.mxu1 %v3221_v32  ;;  %1001 = vmatpush1.msra.mxu0 %v3113_v10 }
 0x174   :  { %1063 = vmatprep.subr.mxu1 %v3225_v37  ;;  %1002 = vmatprep.subr.mxu0 %v3122_v8 }
 0x175   :  { %1064 = vmatpush1.msra.mxu1 %v3228_v39  ;;  %1003 = vmatpush1.msra.mxu0 %v3128_v4 }
 0x176   :  { %1065 = vmatprep.subr.mxu1 %v3232_v36  ;;  %1004 = vmatprep.subr.mxu0 %v3136_v63 }
 0x177   :  { %1066 = vmatpush1.msra.mxu1 %v3240_v43  ;;  %1005 = vmatpush1.msra.mxu0 %v3153_v55 }
 0x178   :  { %1067 = vmatprep.subr.mxu1 %v3244_v44  ;;  %1006 = vmatprep.subr.mxu0 %v3162_v2 }
 0x179   :  { %1068 = vmatpush1.msra.mxu1 %v3247_v47  ;;  %1007 = vmatpush1.msra.mxu0 %v3176_v21 }
 0x17a   :  { %1069 = vmatprep.subr.mxu1 %v3251_v49  ;;  %1040 = vmatprep.mubr.f32.mxu0 %v4193_v34 }
 0x17b   :  { %1070 = vmatpush1.msra.mxu1 %v3259_v52  ;;  %1111 = vmatprep.mubr.f32.mxu1 %v4193_v34  ;;  %v502_v34 = vsub.s32 1, %v497_v40 }
 0x17c   :  { %1071 = vmatprep.subr.mxu1 %v3263_v62  ;;  %1146 = vmatprep.subr.mxu0 %v2966_v33  ;;  %v494_v33 = vld [vmem:[%s4076_s4] sm:$0xf] }
 0x17d   :  { %1072 = vmatpush1.msra.mxu1 %v3266_v26  ;;  %v499_v2 = vrot.slane %v494_v33, %v498_v6 }
 0x17e   :  { %1073 = vmatprep.subr.mxu1 %v3270_v9 }
 0x17f   :  { %1074 = vmatpush1.msra.mxu1 %v3278_v0 }
 0x180   :  { %1075 = vmatprep.subr.mxu1 %v3282_v42  ;;  %v503_v42 = vrot.slane %v494_v33, %v502_v34 }
 0x181   :  { %1076 = vmatpush1.msra.mxu1 %v3285_v38 }
 0x182   :  { %1077 = vmatprep.subr.mxu1 %v3289_v16 }
 0x183   :  { %1078 = vmatpush1.msra.mxu1 %v3297_v45 }
 0x184   :  { %1217 = vmatprep.subr.mxu1 %v3139_v61 }
 0x1dc   :  { %v582_v21 = vpop.f32.mrf.mxu0 }
 0x1de   :  { %v584_v55 = vpop.f32.mrf.mxu0 }
 0x1df   :  { %v585_v18 = vadd.f32 %v584_v55, %v503_v42 }
 0x1e0   :  { %v588_v63 = vpop.f32.mrf.mxu0 }
 0x1e1   :  { %v3367_v38 = vadd.f32 %v588_v63, %v499_v2 }
 0x1e2   :  { %v590_v16 = vpop.f32.mrf.mxu0 }
 0x1e3   :  { %4199 = vst [vmem:[#allocation33_spill] sm:$0xff] %v3367_v38  ;;  %v3369_v0 = vadd.f32 %v590_v16, %v503_v42 }
 0x1e4   :  { %v594_v45 = vpop.f32.mrf.mxu0 }
 0x1e5   :  { %4200 = vst [vmem:[#allocation34_spill] sm:$0xff] %v3369_v0  ;;  %v3371_v61 = vadd.f32 %v594_v45, %v499_v2 }
 0x1e6   :  { %v596_v30 = vpop.f32.mrf.mxu0 }
 0x1e7   :  { %4201 = vst [vmem:[#allocation35_spill] sm:$0xff] %v3371_v61  ;;  %v3373_v4 = vadd.f32 %v596_v30, %v503_v42 }
 0x1e9   :  { %4202 = vst [vmem:[#allocation36_spill] sm:$0xff] %v3373_v4 }
 0x1ea   :  { %v600_v9 = vpop.f32.mrf.mxu0 }
 0x1eb   :  { %v3375_v8 = vadd.f32 %v600_v9, %v499_v2 }
 0x1ec   :  { %v602_v26 = vpop.f32.mrf.mxu0 }
 0x1ed   :  { %4203 = vst [vmem:[#allocation37_spill] sm:$0xff] %v3375_v8  ;;  %v3377_v10 = vadd.f32 %v602_v26, %v503_v42 }
 0x1ef   :  { %4204 = vst [vmem:[#allocation38_spill] sm:$0xff] %v3377_v10  ;;  %v506_v10 = vsub.s32 2, %v497_v40 }
 0x1f0   :  { %v606_v6 = vpop.f32.mrf.mxu0 }
 0x1f1   :  { %v3379_v34 = vadd.f32 %v606_v6, %v499_v2 }
 0x1f2   :  { %v608_v63 = vpop.f32.mrf.mxu0 }
 0x1f3   :  { %4205 = vst [vmem:[#allocation39_spill] sm:$0xff] %v3379_v34  ;;  %v3381_v38 = vadd.f32 %v608_v63, %v503_v42  ;;  %v510_v63 = vsub.s32 3, %v497_v40 }
 0x1f5   :  { %4206 = vst [vmem:[#allocation40_spill] sm:$0xff] %v3381_v38 }
 0x1f6   :  { %v612_v16 = vpop.f32.mrf.mxu0 }
 0x1f7   :  { %v3383_v0 = vadd.f32 %v612_v16, %v499_v2 }
 0x1f8   :  { %v614_v45 = vpop.f32.mrf.mxu0 }
 0x1f9   :  { %4207 = vst [vmem:[#allocation41_spill] sm:$0xff] %v3383_v0  ;;  %v3385_v61 = vadd.f32 %v614_v45, %v503_v42  ;;  %v507_v0 = vrot.slane %v494_v33, %v506_v10  ;;  %v511_v45 = vrot.slane %v494_v33, %v510_v63 }
 0x1fb   :  { %4208 = vst [vmem:[#allocation42_spill] sm:$0xff] %v3385_v61 }
 0x1fc   :  { %v618_v30 = vpop.f32.mrf.mxu0 }
 0x1fd   :  { %v3387_v4 = vadd.f32 %v618_v30, %v499_v2 }
 0x1fe   :  { %v620_v9 = vpop.f32.mrf.mxu0 }
 0x1ff   :  { %4209 = vst [vmem:[#allocation43_spill] sm:$0xff] %v3387_v4  ;;  %v3389_v8 = vadd.f32 %v620_v9, %v503_v42 }
 0x201   :  { %4210 = vst [vmem:[#allocation44_spill] sm:$0xff] %v3389_v8  ;;  %v583_v8 = vadd.f32 %v582_v21, %v499_v2 }
 0x202   :  { %v624_v26 = vpop.f32.mrf.mxu0 }
 0x203   :  { %v3391_v62 = vadd.f32 %v624_v26, %v499_v2 }
 0x204   :  { %v695_v6 = vpop.f32.mrf.mxu1  ;;  %v626_v34 = vpop.f32.mrf.mxu0 }
 0x205   :  { %4211 = vst [vmem:[#allocation45_spill] sm:$0xff] %v3391_v62  ;;  %v3393_v38 = vadd.f32 %v626_v34, %v503_v42 }
 0x206   :  { %v697_v16 = vpop.f32.mrf.mxu1 }
 0x207   :  { %4212 = vst [vmem:[#allocation46_spill] sm:$0xff] %v3393_v38 }
 0x208   :  { %v701_v14 = vpop.f32.mrf.mxu1 }
 0x209   :  { %v3395_v61 = vadd.f32 %v701_v14, %v507_v0 }
 0x20a   :  { %v703_v30 = vpop.f32.mrf.mxu1 }
 0x20b   :  { %4213 = vst [vmem:[#allocation47_spill] sm:$0xff] %v3395_v61  ;;  %v3397_v4 = vadd.f32 %v703_v30, %v511_v45 }
 0x20c   :  { %v707_v9 = vpop.f32.mrf.mxu1 }
 0x20d   :  { %v3399_v52 = vadd.f32 %v707_v9, %v507_v0 }
 0x20e   :  { %v709_v26 = vpop.f32.mrf.mxu1  ;;  %v872_v62 = vpop.f32.mrf.mxu0 }
 0x20f   :  { %4214 = vst [vmem:[#allocation48_spill] sm:$0xff] %v3399_v52  ;;  %v3401_v49 = vadd.f32 %v709_v26, %v511_v45  ;;  %v948_v40 = vadd.f32 %v872_v62, %v583_v8  ;;  %v4248_v52 = vmov 0.0  }
 0x210   :  { %v713_v34 = vpop.f32.mrf.mxu1  ;;  %v874_v38 = vpop.f32.mrf.mxu0 }
 0x211   :  { %4215 = vst [vmem:[#allocation49_spill] sm:$0xff] %v3401_v49  ;;  %v3403_v10 = vadd.f32 %v713_v34, %v507_v0  ;;  %v2331_v33 = vmul.f32 -1.442695, %v948_v40  ;;  %v949_v14 = vadd.f32 %v874_v38, %v585_v18  ;;  %v4247_v49 = vld [vmem:[#allocation22_spill] sm:$0xff] }
 0x212   :  { %v715_v63 = vpop.f32.mrf.mxu1 }
 0x213   :  { %4216 = vst [vmem:[#allocation50_spill] sm:$0xff] %v3403_v10  ;;  %v3405_v61 = vadd.f32 %v715_v63, %v511_v45  ;;  %2422 = vpow2.f32 %v2331_v33  ;;  %v2332_v30 = vmul.f32 -1.442695, %v949_v14 }
 0x214   :  { %v719_v2 = vpop.f32.mrf.mxu1 }
 0x215   :  { %4217 = vst [vmem:[#allocation51_spill] sm:$0xff] %v3405_v61  ;;  %v3407_v21 = vadd.f32 %v719_v2, %v507_v0  ;;  %2424 = vpow2.f32 %v2332_v30 }
 0x216   :  { %v721_v9 = vpop.f32.mrf.mxu1 }
 0x217   :  { %4218 = vst [vmem:[#allocation52_spill] sm:$0xff] %v3407_v21  ;;  %v3409_v42 = vadd.f32 %v721_v9, %v511_v45  ;;  %v696_v9 = vadd.f32 %v695_v6, %v507_v0 }
 0x218   :  { %v725_v55 = vpop.f32.mrf.mxu1 }
 0x219   :  { %4219 = vst [vmem:[#allocation53_spill] sm:$0xff] %v3409_v42  ;;  %v3411_v8 = vadd.f32 %v725_v55, %v507_v0 }
 0x21a   :  { %v727_v62 = vpop.f32.mrf.mxu1 }
 0x21b   :  { %4220 = vst [vmem:[#allocation54_spill] sm:$0xff] %v3411_v8  ;;  %v3413_v26 = vadd.f32 %v727_v62, %v511_v45  ;;  %v698_v62 = vadd.f32 %v697_v16, %v511_v45 }
 0x21c   :  { %v731_v40 = vpop.f32.mrf.mxu1 }
 0x21d   :  { %4221 = vst [vmem:[#allocation55_spill] sm:$0xff] %v3413_v26  ;;  %v3415_v38 = vadd.f32 %v731_v40, %v507_v0 }
 0x21e   :  { %v733_v18 = vpop.f32.mrf.mxu1 }
 0x21f   :  { %4222 = vst [vmem:[#allocation56_spill] sm:$0xff] %v3415_v38  ;;  %v3417_v34 = vadd.f32 %v733_v18, %v511_v45 }
 0x220   :  { %v2423_v33 = vpop.eup %2422  ;;  %v737_v14 = vpop.f32.mrf.mxu1 }
 0x221   :  { %4223 = vst [vmem:[#allocation57_spill] sm:$0xff] %v3417_v34  ;;  %v3419_v63 = vadd.f32 %v737_v14, %v507_v0  ;;  %v961_v42 = vadd.f32 1.0, %v2423_v33 }
 0x222   :  { %v2425_v30 = vpop.eup %2424  ;;  %v739_v2 = vpop.f32.mrf.mxu1 }
 0x223   :  { %4224 = vst [vmem:[#allocation58_spill] sm:$0xff] %v3419_v63  ;;  %v3421_v21 = vadd.f32 %v739_v2, %v511_v45  ;;  %v962_v55 = vadd.f32 1.0, %v2425_v30  ;;  %2426 = vrcp.f32 %v961_v42  ;;  %v4233_v30 = vld [vmem:[#allocation14_spill] sm:$0xff]  ;;  %v4234_v2 = vld [vmem:[#allocation25_spill] sm:$0xff] }
 0x224   :  { %v943_v8 = vpop.f32.mrf.mxu1 }
 0x225   :  { %4225 = vst [vmem:[#allocation59_spill] sm:$0xff] %v3421_v21  ;;  %v950_v26 = vadd.f32 %v943_v8, %v696_v9  ;;  %2428 = vrcp.f32 %v962_v55  ;;  %v4228_v8 = vld [vmem:[#allocation11_spill] sm:$0xff]  ;;  %v4236_v55 = vld [vmem:[#allocation26_spill] sm:$0xff] }
 0x226   :  { %v945_v61 = vpop.f32.mrf.mxu1  ;;  %v4235_v9 = vld [vmem:[#allocation15_spill] sm:$0xff] }
 0x227   :  { %v2333_v40 = vmul.f32 -1.442695, %v950_v26  ;;  %v951_v38 = vadd.f32 %v945_v61, %v698_v62  ;;  %v4226_v61 = vld [vmem:[#allocation9_spill] sm:$0xff]  ;;  %v4229_v26 = vld [vmem:[#allocation12_spill] sm:$0xff]  ;;  %v4246_v21 = vld [vmem:[#allocation31_spill] sm:$0xff] }
 0x228   :  { %v4237_v62 = vld [vmem:[#allocation16_spill] sm:$0xff] }
 0x229   :  { %2430 = vpow2.f32 %v2333_v40  ;;  %v4238_v40 = vld [vmem:[#allocation27_spill] sm:$0xff] }
 0x22a   :  { %2432 = vtanh.f32 %v951_v38  ;;  %v4230_v38 = vld [vmem:[#allocation23_spill] sm:$0xff] }
 0x230   :  { %v2427_v18 = vpop.eup %2426 }
 0x232   :  { %v2429_v14 = vpop.eup %2428 }
 0x233   :  { %v971_v0 = vmul.f32 0.0, %v2429_v14  ;;  %v4240_v14 = vld [vmem:[#allocation28_spill] sm:$0xff] }
 0x236   :  { %v2431_v63 = vpop.eup %2430 }
 0x237   :  { %v2433_v34 = vpop.eup %2432  ;;  %v963_v10 = vadd.f32 1.0, %v2431_v63  ;;  %v4232_v63 = vld [vmem:[#allocation24_spill] sm:$0xff] }
 0x238   :  { %v972_v6 = vmul.f32 %v2433_v34, %v2427_v18  ;;  %v4231_v34 = vld [vmem:[#allocation13_spill] sm:$0xff] }
 0x239   :  { %2434 = vrcp.f32 %v963_v10  ;;  %v4227_v10 = vld [vmem:[#allocation10_spill] sm:$0xff]  ;;  %v4239_v18 = vld [vmem:[#allocation17_spill] sm:$0xff] }
 0x23a   :  { %v3423_v33 = vadd.f32 %v972_v6, %v971_v0  ;;  %v4241_v0 = vld [vmem:[#allocation18_spill] sm:$0xff]  ;;  %v4242_v6 = vld [vmem:[#allocation29_spill] sm:$0xff] }
 0x23c   :  { %2436 = vtanh.f32 %v3423_v33 }
 0x246   :  { %v2435_v16 = vpop.eup %2434 }
 0x249   :  { %v2437_v45 = vpop.eup %2436 }
 0x24a   :  { %v975_v42 = vmul.f32 %v2437_v45, %v2435_v16  ;;  %v4243_v16 = vld [vmem:[#allocation20_spill] sm:$0xff]  ;;  %v4244_v45 = vld [vmem:[#allocation30_spill] sm:$0xff] }
 0x24c   :  { %1041 = vmatmul.mubr.f32.vlgmr.msra.gmra.mxu0 %v975_v42  ;;  %1112 = vmatmul.mubr.f32.vlgmr.msra.gmra.mxu1 %v975_v42  ;;  %v4245_v42 = vld [vmem:[#allocation21_spill] sm:$0xff] }
 0x24d   :  { %1147 = vmatpush1.msra.mxu0 %v2969_v35  ;;  %1218 = vmatpush1.msra.mxu1 %v3143_v59 }
 0x24e   :  { %1148 = vmatprep.subr.mxu0 %v2974_v41  ;;  %1219 = vmatprep.subr.mxu1 %v3150_v57 }
 0x24f   :  { %1149 = vmatpush1.msra.mxu0 %v4226_v61  ;;  %1220 = vmatpush1.msra.mxu1 %v3160_v53 }
 0x250   :  { %1150 = vmatprep.subr.mxu0 %v4227_v10  ;;  %1221 = vmatprep.subr.mxu1 %v3166_v51 }
 0x251   :  { %1151 = vmatpush1.msra.mxu0 %v4228_v8  ;;  %1222 = vmatpush1.msra.mxu1 %v3169_v12 }
 0x252   :  { %1152 = vmatprep.subr.mxu0 %v4229_v26  ;;  %1223 = vmatprep.subr.mxu1 %v3173_v20 }
 0x253   :  { %1153 = vmatpush1.msra.mxu0 %v3002_v46  ;;  %1224 = vmatpush1.msra.mxu1 %v3183_v22 }
 0x254   :  { %1154 = vmatprep.subr.mxu0 %v3009_v48  ;;  %1225 = vmatprep.subr.mxu1 %v3187_v23 }
 0x255   :  { %1155 = vmatpush1.msra.mxu0 %v3012_v50  ;;  %1226 = vmatpush1.msra.mxu1 %v3190_v24 }
 0x256   :  { %1156 = vmatprep.subr.mxu0 %v3020_v54  ;;  %1227 = vmatprep.subr.mxu1 %v3194_v25 }
 0x257   :  { %1157 = vmatpush1.msra.mxu0 %v3024_v56  ;;  %1228 = vmatpush1.msra.mxu1 %v3202_v27 }
 0x258   :  { %1158 = vmatprep.subr.mxu0 %v3030_v58  ;;  %1229 = vmatprep.subr.mxu1 %v3206_v28 }
 0x259   :  { %1159 = vmatpush1.msra.mxu0 %v3033_v60  ;;  %1230 = vmatpush1.msra.mxu1 %v3209_v29 }
 0x25a   :  { %1160 = vmatprep.subr.mxu0 %v3041_v1  ;;  %1231 = vmatprep.subr.mxu1 %v3213_v31 }
 0x25b   :  { %1161 = vmatpush1.msra.mxu0 %v3047_v3  ;;  %1232 = vmatpush1.msra.mxu1 %v3221_v32 }
 0x25c   :  { %1162 = vmatprep.subr.mxu0 %v3055_v5  ;;  %1233 = vmatprep.subr.mxu1 %v3225_v37 }
 0x25d   :  { %1163 = vmatpush1.msra.mxu0 %v3059_v7  ;;  %1234 = vmatpush1.msra.mxu1 %v3228_v39 }
 0x25e   :  { %1164 = vmatprep.subr.mxu0 %v3068_v11  ;;  %1235 = vmatprep.subr.mxu1 %v3232_v36 }
 0x25f   :  { %1165 = vmatpush1.msra.mxu0 %v3074_v13  ;;  %1236 = vmatpush1.msra.mxu1 %v3240_v43 }
 0x260   :  { %1166 = vmatprep.subr.mxu0 %v3082_v15  ;;  %1237 = vmatprep.subr.mxu1 %v3244_v44 }
 0x261   :  { %1167 = vmatpush1.msra.mxu0 %v3086_v17  ;;  %1238 = vmatpush1.msra.mxu1 %v3247_v47 }
 0x262   :  { %1168 = vmatprep.subr.mxu0 %v3093_v19  ;;  %1239 = vmatprep.subr.mxu1 %v4230_v38 }
 0x263   :  { %1169 = vmatpush1.msra.mxu0 %v4231_v34  ;;  %1240 = vmatpush1.msra.mxu1 %v4232_v63 }
 0x264   :  { %1170 = vmatprep.subr.mxu0 %v4233_v30  ;;  %1241 = vmatprep.subr.mxu1 %v4234_v2 }
 0x265   :  { %1171 = vmatpush1.msra.mxu0 %v4235_v9  ;;  %1242 = vmatpush1.msra.mxu1 %v4236_v55  ;;  %v4254_v9 = vld [vmem:[#allocation47_spill] sm:$0xff] }
 0x266   :  { %1172 = vmatprep.subr.mxu0 %v4237_v62  ;;  %1243 = vmatprep.subr.mxu1 %v4238_v40  ;;  %v4249_v40 = vld [vmem:[#allocation32_spill] sm:$0xff] }
 0x267   :  { %1173 = vmatpush1.msra.mxu0 %v4239_v18  ;;  %1244 = vmatpush1.msra.mxu1 %v4240_v14  ;;  %v4250_v14 = vld [vmem:[#allocation8_spill] sm:$0xff] }
 0x268   :  { %1174 = vmatprep.subr.mxu0 %v4241_v0  ;;  %1245 = vmatprep.subr.mxu1 %v4242_v6  ;;  %v4251_v0 = vld [vmem:[#allocation19_spill] sm:$0xff] }
 0x269   :  { %1175 = vmatpush1.msra.mxu0 %v4243_v16  ;;  %1246 = vmatpush1.msra.mxu1 %v4244_v45  ;;  %v4252_v16 = vld [vmem:[#allocation33_spill] sm:$0xff] }
 0x26a   :  { %1176 = vmatprep.subr.mxu0 %v4245_v42  ;;  %1247 = vmatprep.subr.mxu1 %v4246_v21  ;;  %v4253_v42 = vld [vmem:[#allocation34_spill] sm:$0xff] }
 0x26b   :  { %1177 = vmatpush1.msra.mxu0 %v4247_v49  ;;  %1210 = vmatprep.mubr.f32.mxu0 %v4248_v52 }
 0x26c   :  { %1248 = vmatpush1.msra.mxu1 %v4249_v40  ;;  %1281 = vmatprep.mubr.f32.mxu1 %v4248_v52 }
 0x26d   :  { %1316 = vmatprep.subr.mxu0 %v4250_v14  ;;  %1387 = vmatprep.subr.mxu1 %v4251_v0 }
 0x30c   :  { %v1042_v6 = vpop.f32.mrf.mxu0  ;;  %v1113_v49 = vpop.f32.mrf.mxu1 }
 0x30d   :  { %v1118_v18 = vadd.f32 %v1042_v6, %v4252_v16  ;;  %v1120_v2 = vadd.f32 %v1113_v49, %v4254_v9 }
 0x30e   :  { %v1044_v45 = vpop.f32.mrf.mxu0  ;;  %v1115_v40 = vpop.f32.mrf.mxu1 }
 0x30f   :  { %v2334_v62 = vmul.f32 -1.442695, %v1118_v18  ;;  %v1119_v55 = vadd.f32 %v1044_v45, %v4253_v42  ;;  %v2336_v30 = vmul.f32 -1.442695, %v1120_v2  ;;  %v1121_v52 = vadd.f32 %v1115_v40, %v3397_v4 }
 0x311   :  { %2438 = vpow2.f32 %v2334_v62  ;;  %v2335_v21 = vmul.f32 -1.442695, %v1119_v55 }
 0x313   :  { %2440 = vpow2.f32 %v2335_v21 }
 0x314   :  { %2442 = vpow2.f32 %v2336_v30 }
 0x315   :  { %2444 = vtanh.f32 %v1121_v52  ;;  %v3564_v52 = vld [vmem:[#allocation2 + $0x1e8] sm:$0xff] }
 0x316   :  { %4273 = vst [vmem:[#allocation9_spill] sm:$0xff] %v3564_v52 }
 0x31e   :  { %v2439_v14 = vpop.eup %2438 }
 0x31f   :  { %v1131_v63 = vadd.f32 1.0, %v2439_v14  ;;  %v4277_v14 = vld [vmem:[#allocation48_spill] sm:$0xff] }
 0x320   :  { %v2441_v0 = vpop.eup %2440 }
 0x321   :  { %2446 = vrcp.f32 %v1131_v63  ;;  %v1132_v6 = vadd.f32 1.0, %v2441_v0  ;;  %v2443_v18 = vpop.eup %2442  ;;  %v4276_v63 = vld [vmem:[#allocation36_spill] sm:$0xff] }
 0x322   :  { %v2445_v16 = vpop.eup %2444  ;;  %v1133_v45 = vadd.f32 1.0, %v2443_v18 }
 0x323   :  { %2448 = vrcp.f32 %v1132_v6 }
 0x324   :  { %2450 = vrcp.f32 %v1133_v45 }
 0x32e   :  { %v2447_v62 = vpop.eup %2446 }
 0x32f   :  { %v1142_v55 = vmul.f32 %v2447_v62, %v2445_v16  ;;  %v4278_v62 = vld [vmem:[#allocation49_spill] sm:$0xff] }
 0x330   :  { %v2449_v21 = vpop.eup %2448 }
 0x331   :  { %v1141_v49 = vmul.f32 %v2449_v21, %v3423_v33  ;;  %v2451_v4 = vpop.eup %2450  ;;  %v4274_v33 = vld [vmem:[#allocation19_spill] sm:$0xff] }
 0x333   :  { %v3497_v9 = vadd.f32 %v1142_v55, %v1141_v49 }
 0x335   :  { %2452 = vtanh.f32 %v3497_v9 }
 0x342   :  { %v2453_v30 = vpop.eup %2452 }
 0x343   :  { %v1145_v2 = vmul.f32 %v2453_v30, %v2451_v4 }
 0x345   :  { %1211 = vmatmul.mubr.f32.vlgmr.msra.gmra.mxu0 %v1145_v2  ;;  %1282 = vmatmul.mubr.f32.vlgmr.msra.gmra.mxu1 %v1145_v2 }
 0x346   :  { %1317 = vmatpush1.msra.mxu0 %v2969_v35  ;;  %1388 = vmatpush1.msra.mxu1 %v3143_v59  ;;  %v4255_v35 = vld [vmem:[#allocation24_spill] sm:$0xff] }
 0x347   :  { %1318 = vmatprep.subr.mxu0 %v2974_v41  ;;  %1389 = vmatprep.subr.mxu1 %v3150_v57  ;;  %v4256_v41 = vld [vmem:[#allocation14_spill] sm:$0xff] }
 0x348   :  { %1319 = vmatpush1.msra.mxu0 %v4226_v61  ;;  %1390 = vmatpush1.msra.mxu1 %v3160_v53 }
 0x349   :  { %1320 = vmatprep.subr.mxu0 %v4227_v10  ;;  %1391 = vmatprep.subr.mxu1 %v3166_v51  ;;  %v4275_v10 = vld [vmem:[#allocation35_spill] sm:$0xff] }
 0x34a   :  { %1321 = vmatpush1.msra.mxu0 %v4228_v8  ;;  %1392 = vmatpush1.msra.mxu1 %v3169_v12 }
 0x34b   :  { %1322 = vmatprep.subr.mxu0 %v4229_v26  ;;  %1393 = vmatprep.subr.mxu1 %v3173_v20 }
 0x34c   :  { %1323 = vmatpush1.msra.mxu0 %v3002_v46  ;;  %1394 = vmatpush1.msra.mxu1 %v3183_v22  ;;  %v4257_v46 = vld [vmem:[#allocation25_spill] sm:$0xff] }
 0x34d   :  { %1324 = vmatprep.subr.mxu0 %v3009_v48  ;;  %1395 = vmatprep.subr.mxu1 %v3187_v23  ;;  %v4258_v48 = vld [vmem:[#allocation15_spill] sm:$0xff] }
 0x34e   :  { %1325 = vmatpush1.msra.mxu0 %v3012_v50  ;;  %1396 = vmatpush1.msra.mxu1 %v3190_v24  ;;  %v4259_v50 = vld [vmem:[#allocation26_spill] sm:$0xff] }
 0x34f   :  { %1326 = vmatprep.subr.mxu0 %v3020_v54  ;;  %1397 = vmatprep.subr.mxu1 %v3194_v25  ;;  %v4260_v54 = vld [vmem:[#allocation16_spill] sm:$0xff] }
 0x350   :  { %1327 = vmatpush1.msra.mxu0 %v3024_v56  ;;  %1398 = vmatpush1.msra.mxu1 %v3202_v27  ;;  %v4261_v56 = vld [vmem:[#allocation27_spill] sm:$0xff] }
 0x351   :  { %1328 = vmatprep.subr.mxu0 %v3030_v58  ;;  %1399 = vmatprep.subr.mxu1 %v3206_v28  ;;  %v4262_v58 = vld [vmem:[#allocation17_spill] sm:$0xff] }
 0x352   :  { %1329 = vmatpush1.msra.mxu0 %v3033_v60  ;;  %1400 = vmatpush1.msra.mxu1 %v3209_v29  ;;  %v4263_v60 = vld [vmem:[#allocation28_spill] sm:$0xff] }
 0x353   :  { %1330 = vmatprep.subr.mxu0 %v3041_v1  ;;  %1401 = vmatprep.subr.mxu1 %v3213_v31  ;;  %v4264_v1 = vld [vmem:[#allocation18_spill] sm:$0xff] }
 0x354   :  { %1331 = vmatpush1.msra.mxu0 %v3047_v3  ;;  %1402 = vmatpush1.msra.mxu1 %v3221_v32  ;;  %v4265_v3 = vld [vmem:[#allocation29_spill] sm:$0xff] }
 0x355   :  { %1332 = vmatprep.subr.mxu0 %v3055_v5  ;;  %1403 = vmatprep.subr.mxu1 %v3225_v37  ;;  %v4266_v5 = vld [vmem:[#allocation20_spill] sm:$0xff] }
 0x356   :  { %1333 = vmatpush1.msra.mxu0 %v3059_v7  ;;  %1404 = vmatpush1.msra.mxu1 %v3228_v39  ;;  %v4267_v7 = vld [vmem:[#allocation30_spill] sm:$0xff] }
 0x357   :  { %1334 = vmatprep.subr.mxu0 %v3068_v11  ;;  %1405 = vmatprep.subr.mxu1 %v3232_v36  ;;  %v4268_v11 = vld [vmem:[#allocation21_spill] sm:$0xff] }
 0x358   :  { %1335 = vmatpush1.msra.mxu0 %v3074_v13  ;;  %1406 = vmatpush1.msra.mxu1 %v3240_v43  ;;  %v4269_v13 = vld [vmem:[#allocation31_spill] sm:$0xff] }
 0x359   :  { %1336 = vmatprep.subr.mxu0 %v3082_v15  ;;  %1407 = vmatprep.subr.mxu1 %v3244_v44  ;;  %v4270_v15 = vld [vmem:[#allocation22_spill] sm:$0xff] }
 0x35a   :  { %1337 = vmatpush1.msra.mxu0 %v3086_v17  ;;  %1408 = vmatpush1.msra.mxu1 %v3247_v47  ;;  %v4271_v17 = vmov 0.0  }
 0x35b   :  { %1338 = vmatprep.subr.mxu0 %v3093_v19  ;;  %1409 = vmatprep.subr.mxu1 %v4230_v38  ;;  %v4272_v19 = vld [vmem:[#allocation32_spill] sm:$0xff] }
 0x35c   :  { %1339 = vmatpush1.msra.mxu0 %v4231_v34  ;;  %1410 = vmatpush1.msra.mxu1 %v4255_v35 }
 0x35d   :  { %1340 = vmatprep.subr.mxu0 %v4256_v41  ;;  %1411 = vmatprep.subr.mxu1 %v4257_v46 }
 0x35e   :  { %1341 = vmatpush1.msra.mxu0 %v4258_v48  ;;  %1412 = vmatpush1.msra.mxu1 %v4259_v50 }
 0x35f   :  { %1342 = vmatprep.subr.mxu0 %v4260_v54  ;;  %1413 = vmatprep.subr.mxu1 %v4261_v56 }
 0x360   :  { %1343 = vmatpush1.msra.mxu0 %v4262_v58  ;;  %1414 = vmatpush1.msra.mxu1 %v4263_v60 }
 0x361   :  { %1344 = vmatprep.subr.mxu0 %v4264_v1  ;;  %1415 = vmatprep.subr.mxu1 %v4265_v3 }
 0x362   :  { %1345 = vmatpush1.msra.mxu0 %v4266_v5  ;;  %1416 = vmatpush1.msra.mxu1 %v4267_v7 }
 0x363   :  { %1346 = vmatprep.subr.mxu0 %v4268_v11  ;;  %1417 = vmatprep.subr.mxu1 %v4269_v13 }
 0x364   :  { %1347 = vmatpush1.msra.mxu0 %v4270_v15  ;;  %1380 = vmatprep.mubr.f32.mxu0 %v4271_v17 }
 0x365   :  { %1418 = vmatpush1.msra.mxu1 %v4272_v19  ;;  %1451 = vmatprep.mubr.f32.mxu1 %v4271_v17 }
 0x366   :  { %1486 = vmatprep.subr.mxu0 %v3564_v52  ;;  %1557 = vmatprep.subr.mxu1 %v4274_v33 }
 0x405   :  { %v1212_v61 = vpop.f32.mrf.mxu0  ;;  %v1283_v42 = vpop.f32.mrf.mxu1 }
 0x406   :  { %v1288_v8 = vadd.f32 %v1212_v61, %v4275_v10  ;;  %v1290_v6 = vadd.f32 %v1283_v42, %v4277_v14  ;;  %v3576_v61 = vld [vmem:[#allocation2 + $0x1e0] sm:$0xff]  ;;  %v3580_v10 = vld [vmem:[#allocation2 + $0x1c8] sm:$0xff] }
 0x407   :  { %v1214_v26 = vpop.f32.mrf.mxu0  ;;  %v1285_v18 = vpop.f32.mrf.mxu1 }
 0x408   :  { %v2337_v34 = vmul.f32 -1.442695, %v1288_v8  ;;  %v1289_v40 = vadd.f32 %v1214_v26, %v4276_v63  ;;  %v2339_v16 = vmul.f32 -1.442695, %v1290_v6  ;;  %v1291_v55 = vadd.f32 %v1285_v18, %v4278_v62  ;;  %v3588_v8 = vld [vmem:[#allocation2 + $0x1a8] sm:$0xff]  ;;  %v3592_v26 = vld [vmem:[#allocation2 + $0x1a0] sm:$0xff] }
 0x409   :  { %v4291_v62 = vld [vmem:[#allocation51_spill] sm:$0xff] }
 0x40a   :  { %2454 = vpow2.f32 %v2337_v34  ;;  %v2338_v0 = vmul.f32 -1.442695, %v1289_v40  ;;  %v4289_v40 = vld [vmem:[#allocation38_spill] sm:$0xff] }
 0x40c   :  { %2456 = vpow2.f32 %v2338_v0 }
 0x40d   :  { %2458 = vpow2.f32 %v2339_v16 }
 0x40e   :  { %2460 = vtanh.f32 %v1291_v55 }
 0x417   :  { %v2455_v21 = vpop.eup %2454 }
 0x418   :  { %v1301_v45 = vadd.f32 1.0, %v2455_v21 }
 0x419   :  { %v2457_v49 = vpop.eup %2456 }
 0x41a   :  { %2462 = vrcp.f32 %v1301_v45  ;;  %v1302_v4 = vadd.f32 1.0, %v2457_v49  ;;  %v2459_v30 = vpop.eup %2458 }
 0x41b   :  { %v2461_v2 = vpop.eup %2460  ;;  %v1303_v58 = vadd.f32 1.0, %v2459_v30 }
 0x41c   :  { %2464 = vrcp.f32 %v1302_v4 }
 0x41d   :  { %2466 = vrcp.f32 %v1303_v58 }
 0x427   :  { %v2463_v41 = vpop.eup %2462 }
 0x428   :  { %v1312_v48 = vmul.f32 %v2463_v41, %v2461_v2 }
 0x429   :  { %v2465_v54 = vpop.eup %2464 }
 0x42a   :  { %v1311_v1 = vmul.f32 %v2465_v54, %v3497_v9  ;;  %v2467_v11 = vpop.eup %2466  ;;  %v3584_v9 = vld [vmem:[#allocation2 + $0x1c0] sm:$0xff] }
 0x42c   :  { %v3573_v5 = vadd.f32 %v1312_v48, %v1311_v1 }
 0x42e   :  { %2468 = vtanh.f32 %v3573_v5 }
 0x43b   :  { %v2469_v15 = vpop.eup %2468 }
 0x43c   :  { %v1315_v33 = vmul.f32 %v2469_v15, %v2467_v11 }
 0x43e   :  { %1381 = vmatmul.mubr.f32.vlgmr.msra.gmra.mxu0 %v1315_v33  ;;  %1452 = vmatmul.mubr.f32.vlgmr.msra.gmra.mxu1 %v1315_v33 }
 0x43f   :  { %1487 = vmatpush1.msra.mxu0 %v3576_v61  ;;  %1558 = vmatpush1.msra.mxu1 %v3143_v59  ;;  %v3596_v59 = vld [vmem:[#allocation2 + $0x188] sm:$0xff] }
 0x440   :  { %1488 = vmatprep.subr.mxu0 %v3580_v10  ;;  %1559 = vmatprep.subr.mxu1 %v3150_v57  ;;  %v3600_v57 = vld [vmem:[#allocation2 + $0x180] sm:$0xff] }
 0x441   :  { %1489 = vmatpush1.msra.mxu0 %v3584_v9  ;;  %1560 = vmatpush1.msra.mxu1 %v3160_v53  ;;  %v3604_v53 = vld [vmem:[#allocation2 + $0x168] sm:$0xff] }
 0x442   :  { %1490 = vmatprep.subr.mxu0 %v3588_v8  ;;  %1561 = vmatprep.subr.mxu1 %v3166_v51  ;;  %v3608_v51 = vld [vmem:[#allocation2 + $0x160] sm:$0xff] }
 0x443   :  { %1491 = vmatpush1.msra.mxu0 %v3592_v26  ;;  %1562 = vmatpush1.msra.mxu1 %v3169_v12  ;;  %v3612_v12 = vld [vmem:[#allocation2 + $0x148] sm:$0xff] }
 0x444   :  { %1492 = vmatprep.subr.mxu0 %v3596_v59  ;;  %1563 = vmatprep.subr.mxu1 %v3173_v20  ;;  %v3616_v20 = vld [vmem:[#allocation2 + $0x140] sm:$0xff] }
 0x445   :  { %1493 = vmatpush1.msra.mxu0 %v3600_v57  ;;  %1564 = vmatpush1.msra.mxu1 %v3183_v22  ;;  %v3620_v22 = vld [vmem:[#allocation2 + $0x128] sm:$0xff] }
 0x446   :  { %1494 = vmatprep.subr.mxu0 %v3604_v53  ;;  %1565 = vmatprep.subr.mxu1 %v3187_v23  ;;  %v3624_v23 = vld [vmem:[#allocation2 + $0x120] sm:$0xff] }
 0x447   :  { %1495 = vmatpush1.msra.mxu0 %v3608_v51  ;;  %1566 = vmatpush1.msra.mxu1 %v3190_v24  ;;  %v3628_v24 = vld [vmem:[#allocation2 + $0x108] sm:$0xff] }
 0x448   :  { %1496 = vmatprep.subr.mxu0 %v3612_v12  ;;  %1567 = vmatprep.subr.mxu1 %v3194_v25  ;;  %v3632_v25 = vld [vmem:[#allocation2 + $0x100] sm:$0xff] }
 0x449   :  { %1497 = vmatpush1.msra.mxu0 %v3616_v20  ;;  %1568 = vmatpush1.msra.mxu1 %v3202_v27  ;;  %v3636_v27 = vld [vmem:[#allocation2 + $0xe8] sm:$0xff] }
 0x44a   :  { %1498 = vmatprep.subr.mxu0 %v3620_v22  ;;  %1569 = vmatprep.subr.mxu1 %v3206_v28  ;;  %v3640_v28 = vld [vmem:[#allocation2 + $0xe0] sm:$0xff] }
 0x44b   :  { %1499 = vmatpush1.msra.mxu0 %v3624_v23  ;;  %1570 = vmatpush1.msra.mxu1 %v3209_v29  ;;  %v3644_v29 = vld [vmem:[#allocation2 + $0xc8] sm:$0xff] }
 0x44c   :  { %1500 = vmatprep.subr.mxu0 %v3628_v24  ;;  %1571 = vmatprep.subr.mxu1 %v3213_v31  ;;  %v3648_v31 = vld [vmem:[#allocation2 + $0xc0] sm:$0xff] }
 0x44d   :  { %1501 = vmatpush1.msra.mxu0 %v3632_v25  ;;  %1572 = vmatpush1.msra.mxu1 %v3221_v32  ;;  %v3652_v32 = vld [vmem:[#allocation2 + $0xa8] sm:$0xff] }
 0x44e   :  { %1502 = vmatprep.subr.mxu0 %v3636_v27  ;;  %1573 = vmatprep.subr.mxu1 %v3225_v37  ;;  %v3656_v37 = vld [vmem:[#allocation2 + $0xa0] sm:$0xff] }
 0x44f   :  { %1503 = vmatpush1.msra.mxu0 %v3640_v28  ;;  %1574 = vmatpush1.msra.mxu1 %v3228_v39  ;;  %v3660_v39 = vld [vmem:[#allocation2 + $0x88] sm:$0xff] }
 0x450   :  { %1504 = vmatprep.subr.mxu0 %v3644_v29  ;;  %1575 = vmatprep.subr.mxu1 %v3232_v36  ;;  %v3664_v36 = vld [vmem:[#allocation2 + $0x80] sm:$0xff] }
 0x451   :  { %1505 = vmatpush1.msra.mxu0 %v3648_v31  ;;  %1576 = vmatpush1.msra.mxu1 %v3240_v43  ;;  %v3668_v43 = vld [vmem:[#allocation2 + $0x68] sm:$0xff] }
 0x452   :  { %1506 = vmatprep.subr.mxu0 %v3652_v32  ;;  %1577 = vmatprep.subr.mxu1 %v3244_v44  ;;  %4279 = vst [vmem:[#allocation10_spill] sm:$0xff] %v3668_v43  ;;  %v3672_v44 = vld [vmem:[#allocation2 + $0x60] sm:$0xff] }
 0x453   :  { %1507 = vmatpush1.msra.mxu0 %v3656_v37  ;;  %1578 = vmatpush1.msra.mxu1 %v3247_v47  ;;  %4280 = vst [vmem:[#allocation11_spill] sm:$0xff] %v3672_v44  ;;  %v3676_v47 = vld [vmem:[#allocation2 + $0x48] sm:$0xff] }
 0x454   :  { %1508 = vmatprep.subr.mxu0 %v3660_v39  ;;  %1579 = vmatprep.subr.mxu1 %v4230_v38  ;;  %4281 = vst [vmem:[#allocation12_spill] sm:$0xff] %v3676_v47  ;;  %v3680_v38 = vld [vmem:[#allocation2 + $0x40] sm:$0xff] }
 0x455   :  { %1509 = vmatpush1.msra.mxu0 %v3664_v36  ;;  %1580 = vmatpush1.msra.mxu1 %v4255_v35  ;;  %4282 = vst [vmem:[#allocation23_spill] sm:$0xff] %v3680_v38  ;;  %v3684_v35 = vld [vmem:[#allocation2 + $0x28] sm:$0xff] }
 0x456   :  { %1510 = vmatprep.subr.mxu0 %v3668_v43  ;;  %1581 = vmatprep.subr.mxu1 %v4257_v46  ;;  %4283 = vst [vmem:[#allocation13_spill] sm:$0xff] %v3684_v35  ;;  %v3688_v46 = vld [vmem:[#allocation2 + $0x20] sm:$0xff] }
 0x457   :  { %1511 = vmatpush1.msra.mxu0 %v3672_v44  ;;  %1582 = vmatpush1.msra.mxu1 %v4259_v50  ;;  %4284 = vst [vmem:[#allocation8_spill] sm:$0xff] %v3688_v46  ;;  %v3692_v50 = vld [vmem:[#allocation2 + $0x8] sm:$0xff] }
 0x458   :  { %1512 = vmatprep.subr.mxu0 %v3676_v47  ;;  %1583 = vmatprep.subr.mxu1 %v4261_v56  ;;  %4285 = vst [vmem:[#allocation33_spill] sm:$0xff] %v3692_v50  ;;  %v3696_v56 = vld [vmem:[#allocation2] sm:$0xff] }
 0x459   :  { %1513 = vmatpush1.msra.mxu0 %v3680_v38  ;;  %1584 = vmatpush1.msra.mxu1 %v4263_v60  ;;  %4286 = vst [vmem:[#allocation34_spill] sm:$0xff] %v3696_v56  ;;  %v3703_v60 = vld [vmem:[#allocation2 + $0x1f8] sm:$0xff] }
 0x45a   :  { %1514 = vmatprep.subr.mxu0 %v3684_v35  ;;  %1585 = vmatprep.subr.mxu1 %v4265_v3  ;;  %4287 = vst [vmem:[#allocation47_spill] sm:$0xff] %v3703_v60 }
 0x45b   :  { %1515 = vmatpush1.msra.mxu0 %v3688_v46  ;;  %1586 = vmatpush1.msra.mxu1 %v4267_v7  ;;  %v4288_v7 = vld [vmem:[#allocation37_spill] sm:$0xff] }
 0x45c   :  { %1516 = vmatprep.subr.mxu0 %v3692_v50  ;;  %1587 = vmatprep.subr.mxu1 %v4269_v13 }
 0x45d   :  { %1517 = vmatpush1.msra.mxu0 %v3696_v56  ;;  %1550 = vmatprep.mubr.f32.mxu0 %v4271_v17 }
 0x45e   :  { %1588 = vmatpush1.msra.mxu1 %v4272_v19  ;;  %1621 = vmatprep.mubr.f32.mxu1 %v4271_v17  ;;  %v4290_v19 = vld [vmem:[#allocation50_spill] sm:$0xff] }
 0x45f   :  { %1656 = vmatprep.subr.mxu0 %v3564_v52  ;;  %1727 = vmatprep.subr.mxu1 %v3703_v60 }
 0x4fe   :  { %v1382_v3 = vpop.f32.mrf.mxu0  ;;  %v1453_v14 = vpop.f32.mrf.mxu1 }
 0x4ff   :  { %v1458_v34 = vadd.f32 %v1382_v3, %v4288_v7  ;;  %v1460_v6 = vadd.f32 %v1453_v14, %v4290_v19  ;;  %v3715_v7 = vld [vmem:[#allocation2 + $0x1f0] sm:$0xff]  ;;  %v3751_v19 = vld [vmem:[#allocation2 + $0x158] sm:$0xff] }
 0x500   :  { %v1384_v13 = vpop.f32.mrf.mxu0  ;;  %v1455_v18 = vpop.f32.mrf.mxu1  ;;  %v3747_v14 = vld [vmem:[#allocation2 + $0x170] sm:$0xff] }
 0x501   :  { %v2340_v63 = vmul.f32 -1.442695, %v1458_v34  ;;  %v1459_v0 = vadd.f32 %v1384_v13, %v4289_v40  ;;  %v2342_v16 = vmul.f32 -1.442695, %v1460_v6  ;;  %v1461_v55 = vadd.f32 %v1455_v18, %v4291_v62  ;;  %v3719_v34 = vld [vmem:[#allocation2 + $0x1d8] sm:$0xff]  ;;  %v3755_v6 = vld [vmem:[#allocation2 + $0x150] sm:$0xff] }
 0x502   :  { %v3727_v13 = vld [vmem:[#allocation2 + $0x1b8] sm:$0xff] }
 0x503   :  { %2470 = vpow2.f32 %v2340_v63  ;;  %v2341_v42 = vmul.f32 -1.442695, %v1459_v0  ;;  %v3731_v63 = vld [vmem:[#allocation2 + $0x1b0] sm:$0xff]  ;;  %v3735_v40 = vld [vmem:[#allocation2 + $0x198] sm:$0xff] }
 0x504   :  { %v3739_v0 = vld [vmem:[#allocation2 + $0x190] sm:$0xff]  ;;  %v3759_v18 = vld [vmem:[#allocation2 + $0x138] sm:$0xff] }
 0x505   :  { %2472 = vpow2.f32 %v2341_v42  ;;  %v3743_v42 = vld [vmem:[#allocation2 + $0x178] sm:$0xff] }
 0x506   :  { %2474 = vpow2.f32 %v2342_v16  ;;  %v3763_v16 = vld [vmem:[#allocation2 + $0x130] sm:$0xff]  ;;  %v3767_v62 = vld [vmem:[#allocation2 + $0x118] sm:$0xff] }
 0x507   :  { %2476 = vtanh.f32 %v1461_v55  ;;  %v3771_v55 = vld [vmem:[#allocation2 + $0x110] sm:$0xff] }
 0x510   :  { %v2471_v21 = vpop.eup %2470 }
 0x511   :  { %v1471_v45 = vadd.f32 1.0, %v2471_v21  ;;  %v3775_v21 = vld [vmem:[#allocation2 + $0xf8] sm:$0xff] }
 0x512   :  { %v2473_v49 = vpop.eup %2472 }
 0x513   :  { %2478 = vrcp.f32 %v1471_v45  ;;  %v1472_v4 = vadd.f32 1.0, %v2473_v49  ;;  %v2475_v30 = vpop.eup %2474  ;;  %v3779_v45 = vld [vmem:[#allocation2 + $0xf0] sm:$0xff]  ;;  %v3783_v49 = vld [vmem:[#allocation2 + $0xd8] sm:$0xff] }
 0x514   :  { %v2477_v2 = vpop.eup %2476  ;;  %v1473_v58 = vadd.f32 1.0, %v2475_v30  ;;  %v3791_v30 = vld [vmem:[#allocation2 + $0xb8] sm:$0xff] }
 0x515   :  { %2480 = vrcp.f32 %v1472_v4  ;;  %v3787_v4 = vld [vmem:[#allocation2 + $0xd0] sm:$0xff] }
 0x516   :  { %2482 = vrcp.f32 %v1473_v58  ;;  %v3811_v58 = vld [vmem:[#allocation2 + $0x70] sm:$0xff] }
 0x517   :  { %4294 = vst [vmem:[#allocation25_spill] sm:$0xff] %v3811_v58 }
 0x520   :  { %v2479_v41 = vpop.eup %2478 }
 0x521   :  { %v1482_v48 = vmul.f32 %v2479_v41, %v2477_v2  ;;  %v3795_v2 = vld [vmem:[#allocation2 + $0xb0] sm:$0xff]  ;;  %v3799_v41 = vld [vmem:[#allocation2 + $0x98] sm:$0xff] }
 0x522   :  { %v2481_v54 = vpop.eup %2480 }
 0x523   :  { %v1481_v1 = vmul.f32 %v2481_v54, %v3573_v5  ;;  %v2483_v15 = vpop.eup %2482  ;;  %v3723_v5 = vld [vmem:[#allocation2 + $0x1d0] sm:$0xff]  ;;  %v3807_v54 = vld [vmem:[#allocation2 + $0x78] sm:$0xff] }
 0x524   :  { %4293 = vst [vmem:[#allocation14_spill] sm:$0xff] %v3807_v54 }
 0x525   :  { %v3711_v11 = vadd.f32 %v1482_v48, %v1481_v1  ;;  %v3803_v48 = vld [vmem:[#allocation2 + $0x90] sm:$0xff]  ;;  %v3815_v1 = vld [vmem:[#allocation2 + $0x58] sm:$0xff] }
 0x526   :  { %4292 = vst [vmem:[#allocation24_spill] sm:$0xff] %v3803_v48  ;;  %4295 = vst [vmem:[#allocation15_spill] sm:$0xff] %v3815_v1 }
 0x527   :  { %2484 = vtanh.f32 %v3711_v11 }
 0x534   :  { %v2485_v33 = vpop.eup %2484 }
 0x535   :  { %v1485_v3 = vmul.f32 %v2485_v33, %v2483_v15  ;;  %v3819_v15 = vld [vmem:[#allocation2 + $0x50] sm:$0xff]  ;;  %v3823_v33 = vld [vmem:[#allocation2 + $0x38] sm:$0xff] }
 0x536   :  { %4296 = vst [vmem:[#allocation26_spill] sm:$0xff] %v3819_v15  ;;  %4297 = vst [vmem:[#allocation16_spill] sm:$0xff] %v3823_v33 }
 0x537   :  { %1551 = vmatmul.mubr.f32.vlgmr.msra.gmra.mxu0 %v1485_v3  ;;  %1622 = vmatmul.mubr.f32.vlgmr.msra.gmra.mxu1 %v1485_v3  ;;  %v3827_v3 = vld [vmem:[#allocation2 + $0x30] sm:$0xff] }
 0x538   :  { %1657 = vmatpush1.msra.mxu0 %v3576_v61  ;;  %1728 = vmatpush1.msra.mxu1 %v3715_v7  ;;  %4298 = vst [vmem:[#allocation27_spill] sm:$0xff] %v3827_v3 }
 0x539   :  { %1658 = vmatprep.subr.mxu0 %v3580_v10  ;;  %1729 = vmatprep.subr.mxu1 %v3719_v34 }
 0x53a   :  { %1659 = vmatpush1.msra.mxu0 %v3584_v9  ;;  %1730 = vmatpush1.msra.mxu1 %v3723_v5 }
 0x53b   :  { %1660 = vmatprep.subr.mxu0 %v3588_v8  ;;  %1731 = vmatprep.subr.mxu1 %v3727_v13 }
 0x53c   :  { %1661 = vmatpush1.msra.mxu0 %v3592_v26  ;;  %1732 = vmatpush1.msra.mxu1 %v3731_v63 }
 0x53d   :  { %1662 = vmatprep.subr.mxu0 %v3596_v59  ;;  %1733 = vmatprep.subr.mxu1 %v3735_v40 }
 0x53e   :  { %1663 = vmatpush1.msra.mxu0 %v3600_v57  ;;  %1734 = vmatpush1.msra.mxu1 %v3739_v0 }
 0x53f   :  { %1664 = vmatprep.subr.mxu0 %v3604_v53  ;;  %1735 = vmatprep.subr.mxu1 %v3743_v42 }
 0x540   :  { %1665 = vmatpush1.msra.mxu0 %v3608_v51  ;;  %1736 = vmatpush1.msra.mxu1 %v3747_v14 }
 0x541   :  { %1666 = vmatprep.subr.mxu0 %v3612_v12  ;;  %1737 = vmatprep.subr.mxu1 %v3751_v19 }
 0x542   :  { %1667 = vmatpush1.msra.mxu0 %v3616_v20  ;;  %1738 = vmatpush1.msra.mxu1 %v3755_v6 }
 0x543   :  { %1668 = vmatprep.subr.mxu0 %v3620_v22  ;;  %1739 = vmatprep.subr.mxu1 %v3759_v18 }
 0x544   :  { %1669 = vmatpush1.msra.mxu0 %v3624_v23  ;;  %1740 = vmatpush1.msra.mxu1 %v3763_v16 }
 0x545   :  { %1670 = vmatprep.subr.mxu0 %v3628_v24  ;;  %1741 = vmatprep.subr.mxu1 %v3767_v62 }
 0x546   :  { %1671 = vmatpush1.msra.mxu0 %v3632_v25  ;;  %1742 = vmatpush1.msra.mxu1 %v3771_v55 }
 0x547   :  { %1672 = vmatprep.subr.mxu0 %v3636_v27  ;;  %1743 = vmatprep.subr.mxu1 %v3775_v21 }
 0x548   :  { %1673 = vmatpush1.msra.mxu0 %v3640_v28  ;;  %1744 = vmatpush1.msra.mxu1 %v3779_v45 }
 0x549   :  { %1674 = vmatprep.subr.mxu0 %v3644_v29  ;;  %1745 = vmatprep.subr.mxu1 %v3783_v49 }
 0x54a   :  { %1675 = vmatpush1.msra.mxu0 %v3648_v31  ;;  %1746 = vmatpush1.msra.mxu1 %v3787_v4 }
 0x54b   :  { %1676 = vmatprep.subr.mxu0 %v3652_v32  ;;  %1747 = vmatprep.subr.mxu1 %v3791_v30 }
 0x54c   :  { %1677 = vmatpush1.msra.mxu0 %v3656_v37  ;;  %1748 = vmatpush1.msra.mxu1 %v3795_v2 }
 0x54d   :  { %1678 = vmatprep.subr.mxu0 %v3660_v39  ;;  %1749 = vmatprep.subr.mxu1 %v3799_v41 }
 0x54e   :  { %1679 = vmatpush1.msra.mxu0 %v3664_v36  ;;  %1750 = vmatpush1.msra.mxu1 %v3803_v48 }
 0x54f   :  { %1680 = vmatprep.subr.mxu0 %v3668_v43  ;;  %1751 = vmatprep.subr.mxu1 %v3807_v54 }
 0x550   :  { %1681 = vmatpush1.msra.mxu0 %v3672_v44  ;;  %1752 = vmatpush1.msra.mxu1 %v3811_v58  ;;  %v4303_v58 = vld [vmem:[#allocation52_spill] sm:$0xff] }
 0x551   :  { %1682 = vmatprep.subr.mxu0 %v3676_v47  ;;  %1753 = vmatprep.subr.mxu1 %v3815_v1  ;;  %v3831_v1 = vld [vmem:[#allocation2 + $0x18] sm:$0xff] }
 0x552   :  { %1683 = vmatpush1.msra.mxu0 %v3680_v38  ;;  %1754 = vmatpush1.msra.mxu1 %v3819_v15  ;;  %4299 = vst [vmem:[#allocation17_spill] sm:$0xff] %v3831_v1 }
 0x553   :  { %1684 = vmatprep.subr.mxu0 %v3684_v35  ;;  %1755 = vmatprep.subr.mxu1 %v3823_v33  ;;  %v3836_v35 = vld [vmem:[#allocation2 + $0x10] sm:$0xff] }
 0x554   :  { %1685 = vmatpush1.msra.mxu0 %v3688_v46  ;;  %1756 = vmatpush1.msra.mxu1 %v3827_v3  ;;  %4300 = vst [vmem:[#allocation28_spill] sm:$0xff] %v3836_v35 }
 0x555   :  { %1686 = vmatprep.subr.mxu0 %v3692_v50  ;;  %1757 = vmatprep.subr.mxu1 %v3831_v1  ;;  %v4301_v50 = vld [vmem:[#allocation39_spill] sm:$0xff]  ;;  %v4302_v1 = vld [vmem:[#allocation40_spill] sm:$0xff] }
 0x556   :  { %1687 = vmatpush1.msra.mxu0 %v3696_v56  ;;  %1720 = vmatprep.mubr.f32.mxu0 %v4271_v17 }
 0x557   :  { %1758 = vmatpush1.msra.mxu1 %v3836_v35  ;;  %1791 = vmatprep.mubr.f32.mxu1 %v4271_v17  ;;  %v4304_v17 = vld [vmem:[#allocation53_spill] sm:$0xff] }
 0x558   :  { %1826 = vmatprep.subr.mxu0 %v3564_v52  ;;  %1897 = vmatprep.subr.mxu1 %v3703_v60 }
 0x5f7   :  { %v1552_v3 = vpop.f32.mrf.mxu0  ;;  %v1623_v47 = vpop.f32.mrf.mxu1 }
 0x5f8   :  { %v1628_v46 = vadd.f32 %v1552_v3, %v4301_v50  ;;  %v1630_v44 = vadd.f32 %v1623_v47, %v4303_v58  ;;  %v4311_v3 = vld [vmem:[#allocation15_spill] sm:$0xff] }
 0x5f9   :  { %v1554_v33 = vpop.f32.mrf.mxu0  ;;  %v1625_v35 = vpop.f32.mrf.mxu1 }
 0x5fa   :  { %v2343_v15 = vmul.f32 -1.442695, %v1628_v46  ;;  %v1629_v38 = vadd.f32 %v1554_v33, %v4302_v1  ;;  %v2345_v54 = vmul.f32 -1.442695, %v1630_v44  ;;  %v1631_v43 = vadd.f32 %v1625_v35, %v4304_v17  ;;  %v4306_v35 = vld [vmem:[#allocation10_spill] sm:$0xff] }
 0x5fc   :  { %2486 = vpow2.f32 %v2343_v15  ;;  %v2344_v56 = vmul.f32 -1.442695, %v1629_v38 }
 0x5fe   :  { %2488 = vpow2.f32 %v2344_v56 }
 0x5ff   :  { %2490 = vpow2.f32 %v2345_v54  ;;  %v4310_v54 = vld [vmem:[#allocation12_spill] sm:$0xff] }
 0x600   :  { %2492 = vtanh.f32 %v1631_v43  ;;  %v4305_v43 = vld [vmem:[#allocation24_spill] sm:$0xff] }
 0x609   :  { %v2487_v52 = vpop.eup %2486 }
 0x60a   :  { %v1641_v48 = vadd.f32 1.0, %v2487_v52 }
 0x60b   :  { %v2489_v60 = vpop.eup %2488 }
 0x60c   :  { %2494 = vrcp.f32 %v1641_v48  ;;  %v1642_v50 = vadd.f32 1.0, %v2489_v60  ;;  %v2491_v46 = vpop.eup %2490  ;;  %v4307_v60 = vld [vmem:[#allocation14_spill] sm:$0xff]  ;;  %v4309_v48 = vld [vmem:[#allocation25_spill] sm:$0xff] }
 0x60d   :  { %v2493_v1 = vpop.eup %2492  ;;  %v1643_v33 = vadd.f32 1.0, %v2491_v46  ;;  %v4313_v46 = vld [vmem:[#allocation26_spill] sm:$0xff] }
 0x60e   :  { %2496 = vrcp.f32 %v1642_v50  ;;  %v4312_v50 = vld [vmem:[#allocation23_spill] sm:$0xff] }
 0x60f   :  { %2498 = vrcp.f32 %v1643_v33  ;;  %v4318_v33 = vld [vmem:[#allocation33_spill] sm:$0xff] }
 0x619   :  { %v2495_v15 = vpop.eup %2494 }
 0x61a   :  { %v1652_v38 = vmul.f32 %v2495_v15, %v2493_v1  ;;  %v4314_v1 = vld [vmem:[#allocation13_spill] sm:$0xff]  ;;  %v4315_v15 = vld [vmem:[#allocation16_spill] sm:$0xff] }
 0x61b   :  { %v2497_v56 = vpop.eup %2496 }
 0x61c   :  { %v1651_v47 = vmul.f32 %v2497_v56, %v3711_v11  ;;  %v2499_v17 = vpop.eup %2498  ;;  %v4308_v11 = vld [vmem:[#allocation11_spill] sm:$0xff] }
 0x61d   :  { %v4317_v56 = vld [vmem:[#allocation27_spill] sm:$0xff] }
 0x61e   :  { %v3847_v58 = vadd.f32 %v1652_v38, %v1651_v47  ;;  %v4316_v38 = vld [vmem:[#allocation8_spill] sm:$0xff]  ;;  %v4319_v47 = vld [vmem:[#allocation17_spill] sm:$0xff] }
 0x620   :  { %2500 = vtanh.f32 %v3847_v58 }
 0x62d   :  { %v2501_v52 = vpop.eup %2500 }
 0x62e   :  { %v1655_v44 = vmul.f32 %v2501_v52, %v2499_v17  ;;  %v4320_v17 = vld [vmem:[#allocation34_spill] sm:$0xff]  ;;  %v4321_v52 = vmov 0.0  }
 0x630   :  { %1721 = vmatmul.mubr.f32.vlgmr.msra.gmra.mxu0 %v1655_v44  ;;  %1792 = vmatmul.mubr.f32.vlgmr.msra.gmra.mxu1 %v1655_v44  ;;  %v4322_v44 = vld [vmem:[#allocation28_spill] sm:$0xff] }
 0x631   :  { %1827 = vmatpush1.msra.mxu0 %v3576_v61  ;;  %1898 = vmatpush1.msra.mxu1 %v3715_v7 }
 0x632   :  { %1828 = vmatprep.subr.mxu0 %v3580_v10  ;;  %1899 = vmatprep.subr.mxu1 %v3719_v34 }
 0x633   :  { %1829 = vmatpush1.msra.mxu0 %v3584_v9  ;;  %1900 = vmatpush1.msra.mxu1 %v3723_v5 }
 0x634   :  { %1830 = vmatprep.subr.mxu0 %v3588_v8  ;;  %1901 = vmatprep.subr.mxu1 %v3727_v13 }
 0x635   :  { %1831 = vmatpush1.msra.mxu0 %v3592_v26  ;;  %1902 = vmatpush1.msra.mxu1 %v3731_v63 }
 0x636   :  { %1832 = vmatprep.subr.mxu0 %v3596_v59  ;;  %1903 = vmatprep.subr.mxu1 %v3735_v40 }
 0x637   :  { %1833 = vmatpush1.msra.mxu0 %v3600_v57  ;;  %1904 = vmatpush1.msra.mxu1 %v3739_v0 }
 0x638   :  { %1834 = vmatprep.subr.mxu0 %v3604_v53  ;;  %1905 = vmatprep.subr.mxu1 %v3743_v42 }
 0x639   :  { %1835 = vmatpush1.msra.mxu0 %v3608_v51  ;;  %1906 = vmatpush1.msra.mxu1 %v3747_v14 }
 0x63a   :  { %1836 = vmatprep.subr.mxu0 %v3612_v12  ;;  %1907 = vmatprep.subr.mxu1 %v3751_v19 }
 0x63b   :  { %1837 = vmatpush1.msra.mxu0 %v3616_v20  ;;  %1908 = vmatpush1.msra.mxu1 %v3755_v6 }
 0x63c   :  { %1838 = vmatprep.subr.mxu0 %v3620_v22  ;;  %1909 = vmatprep.subr.mxu1 %v3759_v18 }
 0x63d   :  { %1839 = vmatpush1.msra.mxu0 %v3624_v23  ;;  %1910 = vmatpush1.msra.mxu1 %v3763_v16 }
 0x63e   :  { %1840 = vmatprep.subr.mxu0 %v3628_v24  ;;  %1911 = vmatprep.subr.mxu1 %v3767_v62 }
 0x63f   :  { %1841 = vmatpush1.msra.mxu0 %v3632_v25  ;;  %1912 = vmatpush1.msra.mxu1 %v3771_v55 }
 0x640   :  { %1842 = vmatprep.subr.mxu0 %v3636_v27  ;;  %1913 = vmatprep.subr.mxu1 %v3775_v21 }
 0x641   :  { %1843 = vmatpush1.msra.mxu0 %v3640_v28  ;;  %1914 = vmatpush1.msra.mxu1 %v3779_v45 }
 0x642   :  { %1844 = vmatprep.subr.mxu0 %v3644_v29  ;;  %1915 = vmatprep.subr.mxu1 %v3783_v49 }
 0x643   :  { %1845 = vmatpush1.msra.mxu0 %v3648_v31  ;;  %1916 = vmatpush1.msra.mxu1 %v3787_v4 }
 0x644   :  { %1846 = vmatprep.subr.mxu0 %v3652_v32  ;;  %1917 = vmatprep.subr.mxu1 %v3791_v30 }
 0x645   :  { %1847 = vmatpush1.msra.mxu0 %v3656_v37  ;;  %1918 = vmatpush1.msra.mxu1 %v3795_v2 }
 0x646   :  { %1848 = vmatprep.subr.mxu0 %v3660_v39  ;;  %1919 = vmatprep.subr.mxu1 %v3799_v41 }
 0x647   :  { %1849 = vmatpush1.msra.mxu0 %v3664_v36  ;;  %1920 = vmatpush1.msra.mxu1 %v4305_v43 }
 0x648   :  { %1850 = vmatprep.subr.mxu0 %v4306_v35  ;;  %1921 = vmatprep.subr.mxu1 %v4307_v60 }
 0x649   :  { %1851 = vmatpush1.msra.mxu0 %v4308_v11  ;;  %1922 = vmatpush1.msra.mxu1 %v4309_v48  ;;  %v4327_v48 = vld [vmem:[#allocation54_spill] sm:$0xff] }
 0x64a   :  { %1852 = vmatprep.subr.mxu0 %v4310_v54  ;;  %1923 = vmatprep.subr.mxu1 %v4311_v3 }
 0x64b   :  { %1853 = vmatpush1.msra.mxu0 %v4312_v50  ;;  %1924 = vmatpush1.msra.mxu1 %v4313_v46  ;;  %v4323_v46 = vld [vmem:[#allocation9_spill] sm:$0xff] }
 0x64c   :  { %1854 = vmatprep.subr.mxu0 %v4314_v1  ;;  %1925 = vmatprep.subr.mxu1 %v4315_v15  ;;  %v4324_v1 = vld [vmem:[#allocation47_spill] sm:$0xff] }
 0x64d   :  { %1855 = vmatpush1.msra.mxu0 %v4316_v38  ;;  %1926 = vmatpush1.msra.mxu1 %v4317_v56  ;;  %v4325_v38 = vld [vmem:[#allocation41_spill] sm:$0xff] }
 0x64e   :  { %1856 = vmatprep.subr.mxu0 %v4318_v33  ;;  %1927 = vmatprep.subr.mxu1 %v4319_v47  ;;  %v4326_v33 = vld [vmem:[#allocation42_spill] sm:$0xff] }
 0x64f   :  { %1857 = vmatpush1.msra.mxu0 %v4320_v17  ;;  %1890 = vmatprep.mubr.f32.mxu0 %v4321_v52 }
 0x650   :  { %1928 = vmatpush1.msra.mxu1 %v4322_v44  ;;  %1961 = vmatprep.mubr.f32.mxu1 %v4321_v52  ;;  %v4328_v52 = vld [vmem:[#allocation55_spill] sm:$0xff] }
 0x651   :  { %1996 = vmatprep.subr.mxu0 %v4323_v46  ;;  %2067 = vmatprep.subr.mxu1 %v4324_v1 }
 0x6f0   :  { %v1722_v15 = vpop.f32.mrf.mxu0  ;;  %v1793_v17 = vpop.f32.mrf.mxu1 }
 0x6f1   :  { %v1798_v50 = vadd.f32 %v1722_v15, %v4325_v38  ;;  %v1800_v11 = vadd.f32 %v1793_v17, %v4327_v48 }
 0x6f2   :  { %v1724_v56 = vpop.f32.mrf.mxu0  ;;  %v1795_v44 = vpop.f32.mrf.mxu1 }
 0x6f3   :  { %v2346_v3 = vmul.f32 -1.442695, %v1798_v50  ;;  %v1799_v54 = vadd.f32 %v1724_v56, %v4326_v33  ;;  %v2348_v60 = vmul.f32 -1.442695, %v1800_v11  ;;  %v1801_v35 = vadd.f32 %v1795_v44, %v4328_v52  ;;  %v2181_v52 = vld [vmem:[%s4077_s5 + $0x78] sm:$0xff]  ;;  %v2180_v44 = vld [vmem:[%s4077_s5 + $0x70] sm:$0xff] }
 0x6f5   :  { %2502 = vpow2.f32 %v2346_v3  ;;  %v2347_v47 = vmul.f32 -1.442695, %v1799_v54 }
 0x6f7   :  { %2504 = vpow2.f32 %v2347_v47 }
 0x6f8   :  { %2506 = vpow2.f32 %v2348_v60 }
 0x6f9   :  { %2508 = vtanh.f32 %v1801_v35 }
 0x702   :  { %v2503_v46 = vpop.eup %2502 }
 0x703   :  { %v1811_v43 = vadd.f32 1.0, %v2503_v46  ;;  %v2179_v46 = vld [vmem:[%s4077_s5 + $0x68] sm:$0xff] }
 0x704   :  { %v2505_v1 = vpop.eup %2504 }
 0x705   :  { %2510 = vrcp.f32 %v1811_v43  ;;  %v1812_v15 = vadd.f32 1.0, %v2505_v1  ;;  %v2507_v50 = vpop.eup %2506  ;;  %v2178_v1 = vld [vmem:[%s4077_s5 + $0x60] sm:$0xff] }
 0x706   :  { %v2509_v38 = vpop.eup %2508  ;;  %v1813_v33 = vadd.f32 1.0, %v2507_v50  ;;  %v2176_v50 = vld [vmem:[%s4077_s5 + $0x50] sm:$0xff] }
 0x707   :  { %2512 = vrcp.f32 %v1812_v15  ;;  %v2177_v15 = vld [vmem:[%s4077_s5 + $0x58] sm:$0xff] }
 0x708   :  { %2514 = vrcp.f32 %v1813_v33  ;;  %v2171_v33 = vld [vmem:[%s4077_s5 + $0x28] sm:$0xff] }
 0x712   :  { %v2511_v3 = vpop.eup %2510 }
 0x713   :  { %v1822_v54 = vmul.f32 %v2511_v3, %v2509_v38  ;;  %v2175_v38 = vld [vmem:[%s4077_s5 + $0x48] sm:$0xff]  ;;  %v2174_v3 = vld [vmem:[%s4077_s5 + $0x40] sm:$0xff] }
 0x714   :  { %v2513_v56 = vpop.eup %2512 }
 0x715   :  { %v1821_v48 = vmul.f32 %v2513_v56, %v3847_v58  ;;  %v2515_v11 = vpop.eup %2514  ;;  %v2172_v56 = vld [vmem:[%s4077_s5 + $0x30] sm:$0xff] }
 0x717   :  { %v3921_v47 = vadd.f32 %v1822_v54, %v1821_v48  ;;  %v2173_v54 = vld [vmem:[%s4077_s5 + $0x38] sm:$0xff]  ;;  %v2170_v48 = vld [vmem:[%s4077_s5 + $0x20] sm:$0xff] }
 0x719   :  { %2516 = vtanh.f32 %v3921_v47 }
 0x726   :  { %v2517_v60 = vpop.eup %2516 }
 0x727   :  { %v1825_v17 = vmul.f32 %v2517_v60, %v2515_v11  ;;  %v2168_v11 = vld [vmem:[%s4077_s5 + $0x10] sm:$0xff]  ;;  %v2167_v60 = vld [vmem:[%s4077_s5 + $0x8] sm:$0xff] }
 0x729   :  { %1891 = vmatmul.mubr.f32.vlgmr.msra.gmra.mxu0 %v1825_v17  ;;  %1962 = vmatmul.mubr.f32.vlgmr.msra.gmra.mxu1 %v1825_v17  ;;  %v2166_v17 = vld [vmem:[%s4077_s5] sm:$0xff] }
 0x72a   :  { %1997 = vmatpush1.msra.mxu0 %v3576_v61  ;;  %2068 = vmatpush1.msra.mxu1 %v3715_v7  ;;  %v4329_v61 = vld [vmem:[#allocation24_spill] sm:$0xff] }
 0x72b   :  { %1998 = vmatprep.subr.mxu0 %v3580_v10  ;;  %2069 = vmatprep.subr.mxu1 %v3719_v34  ;;  %v4330_v10 = vld [vmem:[#allocation10_spill] sm:$0xff]  ;;  %v4348_v7 = vld [vmem:[#allocation44_spill] sm:$0xff] }
 0x72c   :  { %1999 = vmatpush1.msra.mxu0 %v3584_v9  ;;  %2070 = vmatpush1.msra.mxu1 %v3723_v5  ;;  %v4331_v9 = vld [vmem:[#allocation14_spill] sm:$0xff] }
 0x72d   :  { %2000 = vmatprep.subr.mxu0 %v3588_v8  ;;  %2071 = vmatprep.subr.mxu1 %v3727_v13  ;;  %v4332_v8 = vld [vmem:[#allocation11_spill] sm:$0xff] }
 0x72e   :  { %2001 = vmatpush1.msra.mxu0 %v3592_v26  ;;  %2072 = vmatpush1.msra.mxu1 %v3731_v63  ;;  %v4333_v26 = vld [vmem:[#allocation25_spill] sm:$0xff]  ;;  %v4349_v63 = vld [vmem:[#allocation56_spill] sm:$0xff] }
 0x72f   :  { %2002 = vmatprep.subr.mxu0 %v3596_v59  ;;  %2073 = vmatprep.subr.mxu1 %v3735_v40  ;;  %v4334_v59 = vld [vmem:[#allocation12_spill] sm:$0xff] }
 0x730   :  { %2003 = vmatpush1.msra.mxu0 %v3600_v57  ;;  %2074 = vmatpush1.msra.mxu1 %v3739_v0  ;;  %v4335_v57 = vld [vmem:[#allocation15_spill] sm:$0xff] }
 0x731   :  { %2004 = vmatprep.subr.mxu0 %v3604_v53  ;;  %2075 = vmatprep.subr.mxu1 %v3743_v42  ;;  %v4336_v53 = vld [vmem:[#allocation23_spill] sm:$0xff] }
 0x732   :  { %2005 = vmatpush1.msra.mxu0 %v3608_v51  ;;  %2076 = vmatpush1.msra.mxu1 %v3747_v14  ;;  %v4337_v51 = vld [vmem:[#allocation26_spill] sm:$0xff]  ;;  %v4350_v14 = vld [vmem:[#allocation57_spill] sm:$0xff] }
 0x733   :  { %2006 = vmatprep.subr.mxu0 %v3612_v12  ;;  %2077 = vmatprep.subr.mxu1 %v3751_v19  ;;  %v4338_v12 = vld [vmem:[#allocation13_spill] sm:$0xff] }
 0x734   :  { %2007 = vmatpush1.msra.mxu0 %v3616_v20  ;;  %2078 = vmatpush1.msra.mxu1 %v3755_v6  ;;  %v4339_v20 = vld [vmem:[#allocation16_spill] sm:$0xff] }
 0x735   :  { %2008 = vmatprep.subr.mxu0 %v3620_v22  ;;  %2079 = vmatprep.subr.mxu1 %v3759_v18  ;;  %v4340_v22 = vld [vmem:[#allocation8_spill] sm:$0xff] }
 0x736   :  { %2009 = vmatpush1.msra.mxu0 %v3624_v23  ;;  %2080 = vmatpush1.msra.mxu1 %v3763_v16  ;;  %v4341_v23 = vld [vmem:[#allocation27_spill] sm:$0xff] }
 0x737   :  { %2010 = vmatprep.subr.mxu0 %v3628_v24  ;;  %2081 = vmatprep.subr.mxu1 %v3767_v62  ;;  %v4342_v24 = vld [vmem:[#allocation33_spill] sm:$0xff] }
 0x738   :  { %2011 = vmatpush1.msra.mxu0 %v3632_v25  ;;  %2082 = vmatpush1.msra.mxu1 %v3771_v55  ;;  %v4343_v25 = vld [vmem:[#allocation17_spill] sm:$0xff] }
 0x739   :  { %2012 = vmatprep.subr.mxu0 %v3636_v27  ;;  %2083 = vmatprep.subr.mxu1 %v3775_v21  ;;  %v4344_v27 = vld [vmem:[#allocation34_spill] sm:$0xff] }
 0x73a   :  { %2013 = vmatpush1.msra.mxu0 %v3640_v28  ;;  %2084 = vmatpush1.msra.mxu1 %v3779_v45  ;;  %v4345_v28 = vmov 0.0  }
 0x73b   :  { %2014 = vmatprep.subr.mxu0 %v3644_v29  ;;  %2085 = vmatprep.subr.mxu1 %v3783_v49  ;;  %v4346_v29 = vld [vmem:[#allocation28_spill] sm:$0xff] }
 0x73c   :  { %2015 = vmatpush1.msra.mxu0 %v3648_v31  ;;  %2086 = vmatpush1.msra.mxu1 %v3787_v4 }
 0x73d   :  { %2016 = vmatprep.subr.mxu0 %v3652_v32  ;;  %2087 = vmatprep.subr.mxu1 %v3791_v30  ;;  %v4347_v32 = vld [vmem:[#allocation43_spill] sm:$0xff] }
 0x73e   :  { %2017 = vmatpush1.msra.mxu0 %v3656_v37  ;;  %2088 = vmatpush1.msra.mxu1 %v3795_v2 }
 0x73f   :  { %2018 = vmatprep.subr.mxu0 %v3660_v39  ;;  %2089 = vmatprep.subr.mxu1 %v3799_v41 }
 0x740   :  { %2019 = vmatpush1.msra.mxu0 %v3664_v36  ;;  %2090 = vmatpush1.msra.mxu1 %v4329_v61 }
 0x741   :  { %2020 = vmatprep.subr.mxu0 %v4330_v10  ;;  %2091 = vmatprep.subr.mxu1 %v4331_v9  ;;  %v4351_v10 = vld [vmem:[#allocation45_spill] sm:$0xff] }
 0x742   :  { %2021 = vmatpush1.msra.mxu0 %v4332_v8  ;;  %2092 = vmatpush1.msra.mxu1 %v4333_v26 }
 0x743   :  { %2022 = vmatprep.subr.mxu0 %v4334_v59  ;;  %2093 = vmatprep.subr.mxu1 %v4335_v57  ;;  %v4352_v59 = vld [vmem:[#allocation46_spill] sm:$0xff] }
 0x744   :  { %2023 = vmatpush1.msra.mxu0 %v4336_v53  ;;  %2094 = vmatpush1.msra.mxu1 %v4337_v51 }
 0x745   :  { %2024 = vmatprep.subr.mxu0 %v4338_v12  ;;  %2095 = vmatprep.subr.mxu1 %v4339_v20  ;;  %v4353_v12 = vld [vmem:[#allocation58_spill] sm:$0xff] }
 0x746   :  { %2025 = vmatpush1.msra.mxu0 %v4340_v22  ;;  %2096 = vmatpush1.msra.mxu1 %v4341_v23 }
 0x747   :  { %2026 = vmatprep.subr.mxu0 %v4342_v24  ;;  %2097 = vmatprep.subr.mxu1 %v4343_v25  ;;  %v4354_v24 = vld [vmem:[#allocation59_spill] sm:$0xff] }
 0x748   :  { %2027 = vmatpush1.msra.mxu0 %v4344_v27  ;;  %2060 = vmatprep.mubr.f32.mxu0 %v4345_v28 }
 0x749   :  { %2098 = vmatpush1.msra.mxu1 %v4346_v29  ;;  %2131 = vmatprep.mubr.f32.mxu1 %v4345_v28 }
 0x74a   :  { %2373 = vmatprep.subr.mxu0 %v4345_v28 }
 0x7e9   :  { %v1892_v31 = vpop.f32.mrf.mxu0  ;;  %v1963_v13 = vpop.f32.mrf.mxu1 }
 0x7ea   :  { %v1968_v37 = vadd.f32 %v1892_v31, %v4347_v32  ;;  %v1970_v40 = vadd.f32 %v1963_v13, %v4349_v63 }
 0x7eb   :  { %v1894_v39 = vpop.f32.mrf.mxu0  ;;  %v1965_v0 = vpop.f32.mrf.mxu1 }
 0x7ec   :  { %v2349_v36 = vmul.f32 -1.442695, %v1968_v37  ;;  %v1969_v34 = vadd.f32 %v1894_v39, %v4348_v7  ;;  %v2351_v42 = vmul.f32 -1.442695, %v1970_v40  ;;  %v1971_v19 = vadd.f32 %v1965_v0, %v4350_v14 }
 0x7ee   :  { %2518 = vpow2.f32 %v2349_v36  ;;  %v2350_v5 = vmul.f32 -1.442695, %v1969_v34 }
 0x7f0   :  { %2520 = vpow2.f32 %v2350_v5 }
 0x7f1   :  { %2522 = vpow2.f32 %v2351_v42  ;;  %v2355_v42 = vld [vmem:[%s4078_s6] ss:$0 sm:$0xff] }
 0x7f2   :  { %2524 = vtanh.f32 %v1971_v19 }
 0x7fb   :  { %v2519_v6 = vpop.eup %2518 }
 0x7fc   :  { %v1981_v18 = vadd.f32 1.0, %v2519_v6 }
 0x7fd   :  { %v2521_v16 = vpop.eup %2520 }
 0x7fe   :  { %2526 = vrcp.f32 %v1981_v18  ;;  %v1982_v62 = vadd.f32 1.0, %v2521_v16  ;;  %v2523_v55 = vpop.eup %2522 }
 0x7ff   :  { %v2525_v21 = vpop.eup %2524  ;;  %v1983_v30 = vadd.f32 1.0, %v2523_v55 }
 0x800   :  { %2528 = vrcp.f32 %v1982_v62 }
 0x801   :  { %2530 = vrcp.f32 %v1983_v30 }
 0x80b   :  { %v2527_v45 = vpop.eup %2526 }
 0x80c   :  { %v1992_v49 = vmul.f32 %v2527_v45, %v2525_v21 }
 0x80d   :  { %v2529_v4 = vpop.eup %2528 }
 0x80e   :  { %v1991_v2 = vmul.f32 %v2529_v4, %v3921_v47  ;;  %v2531_v58 = vpop.eup %2530  ;;  %v2169_v47 = vld [vmem:[%s4077_s5 + $0x18] sm:$0xff] }
 0x810   :  { %v3994_v41 = vadd.f32 %v1992_v49, %v1991_v2 }
 0x812   :  { %2532 = vtanh.f32 %v3994_v41 }
 0x81f   :  { %v2533_v43 = vpop.eup %2532 }
 0x820   :  { %v1995_v35 = vmul.f32 %v2533_v43, %v2531_v58 }
 0x822   :  { %2061 = vmatmul.mubr.f32.vlgmr.msra.gmra.mxu0 %v1995_v35  ;;  %2132 = vmatmul.mubr.f32.vlgmr.msra.gmra.mxu1 %v1995_v35 }
 0x823   :  { %2374 = vmatpush3.msra.mxu0 %v2181_v52  ;;  %2405 = vmatprep.mubr.msk.f32.mxu0 %vm2664_vm9, %v4345_v28 }
 0x824   :  { %2375 = vmatprep.subr.mxu0 %v4345_v28 }
 0x825   :  { %2376 = vmatpush3.msra.mxu0 %v2180_v44 }
 0x826   :  { %2377 = vmatprep.subr.mxu0 %v4345_v28 }
 0x827   :  { %2378 = vmatpush3.msra.mxu0 %v2179_v46 }
 0x828   :  { %2379 = vmatprep.subr.mxu0 %v4345_v28 }
 0x829   :  { %2380 = vmatpush3.msra.mxu0 %v2178_v1 }
 0x82a   :  { %2381 = vmatprep.subr.mxu0 %v4345_v28 }
 0x82b   :  { %2382 = vmatpush3.msra.mxu0 %v2177_v15 }
 0x82c   :  { %2383 = vmatprep.subr.mxu0 %v4345_v28 }
 0x82d   :  { %2384 = vmatpush3.msra.mxu0 %v2176_v50 }
 0x82e   :  { %2385 = vmatprep.subr.mxu0 %v4345_v28 }
 0x82f   :  { %2386 = vmatpush3.msra.mxu0 %v2175_v38 }
 0x830   :  { %2387 = vmatprep.subr.mxu0 %v4345_v28 }
 0x831   :  { %2388 = vmatpush3.msra.mxu0 %v2174_v3 }
 0x832   :  { %2389 = vmatprep.subr.mxu0 %v4345_v28 }
 0x833   :  { %2390 = vmatpush3.msra.mxu0 %v2173_v54 }
 0x834   :  { %2391 = vmatprep.subr.mxu0 %v4345_v28 }
 0x835   :  { %2392 = vmatpush3.msra.mxu0 %v2172_v56 }
 0x836   :  { %2393 = vmatprep.subr.mxu0 %v4345_v28 }
 0x837   :  { %2394 = vmatpush3.msra.mxu0 %v2171_v33 }
 0x838   :  { %2395 = vmatprep.subr.mxu0 %v4345_v28 }
 0x839   :  { %2396 = vmatpush3.msra.mxu0 %v2170_v48 }
 0x83a   :  { %2397 = vmatprep.subr.mxu0 %v4345_v28 }
 0x83b   :  { %2398 = vmatpush3.msra.mxu0 %v2169_v47 }
 0x83c   :  { %2399 = vmatprep.subr.mxu0 %v4345_v28 }
 0x83d   :  { %2400 = vmatpush3.msra.mxu0 %v2168_v11 }
 0x83e   :  { %2401 = vmatprep.subr.mxu0 %v4345_v28 }
 0x83f   :  { %2402 = vmatpush3.msra.mxu0 %v2167_v60 }
 0x840   :  { %2403 = vmatprep.subr.mxu0 %v4345_v28 }
 0x841   :  { %2404 = vmatpush3.msra.mxu0 %v2166_v17 }
 0x8e2   :  { %v2062_v61 = vpop.f32.mrf.mxu0  ;;  %v2133_v51 = vpop.f32.mrf.mxu1 }
 0x8e3   :  { %v2138_v9 = vadd.f32 %v2062_v61, %v4351_v10  ;;  %v2140_v20 = vadd.f32 %v2133_v51, %v4353_v12 }
 0x8e4   :  { %v2064_v8 = vpop.f32.mrf.mxu0  ;;  %v2135_v22 = vpop.f32.mrf.mxu1 }
 0x8e5   :  { %v2352_v26 = vmul.f32 -1.442695, %v2138_v9  ;;  %v2139_v57 = vadd.f32 %v2064_v8, %v4352_v59  ;;  %v2354_v23 = vmul.f32 -1.442695, %v2140_v20  ;;  %v2141_v25 = vadd.f32 %v2135_v22, %v4354_v24 }
 0x8e7   :  { %2534 = vpow2.f32 %v2352_v26  ;;  %v2353_v53 = vmul.f32 -1.442695, %v2139_v57 }
 0x8e9   :  { %2536 = vpow2.f32 %v2353_v53 }
 0x8ea   :  { %2538 = vpow2.f32 %v2354_v23 }
 0x8eb   :  { %2540 = vtanh.f32 %v2141_v25 }
 0x8f4   :  { %v2535_v27 = vpop.eup %2534 }
 0x8f5   :  { %v2151_v28 = vadd.f32 1.0, %v2535_v27 }
 0x8f6   :  { %v2537_v29 = vpop.eup %2536 }
 0x8f7   :  { %2542 = vrcp.f32 %v2151_v28  ;;  %v2152_v31 = vadd.f32 1.0, %v2537_v29  ;;  %v2539_v32 = vpop.eup %2538 }
 0x8f8   :  { %v2541_v37 = vpop.eup %2540  ;;  %v2153_v34 = vadd.f32 1.0, %v2539_v32 }
 0x8f9   :  { %2544 = vrcp.f32 %v2152_v31 }
 0x8fa   :  { %2546 = vrcp.f32 %v2153_v34 }
 0x904   :  { %v2543_v39 = vpop.eup %2542 }
 0x905   :  { %v2162_v36 = vmul.f32 %v2543_v39, %v2541_v37 }
 0x906   :  { %v2545_v7 = vpop.eup %2544 }
 0x907   :  { %v2161_v5 = vmul.f32 %v2545_v7, %v3994_v41  ;;  %v2547_v63 = vpop.eup %2546 }
 0x909   :  { %v2163_v13 = vadd.f32 %v2162_v36, %v2161_v5 }
 0x90b   :  { %2548 = vtanh.f32 %v2163_v13 }
 0x918   :  { %v2549_v40 = vpop.eup %2548 }
 0x919   :  { %v2165_v0 = vmul.f32 %v2549_v40, %v2547_v63 }
 0x91b   :  { %2406 = vmatmul.mubr.f32.vlgmr.msra.gmra.mxu0 %v2165_v0 }
 0x9db   :  { %v2255_v14 = vpop.f32.mrf.mxu0 }
 0x9dc   :  { %v2256_v19 = vadd.f32 %v2355_v42, %v2255_v14 }
 0x9dd   :  { %v2407_v6 = vpop.f32.mrf.mxu0 }
 0x9de   :  { %2259 = vst [vmem:[#allocation5] sm:$0xff] %v2256_v19 }
 0x9df   :  { %2645 = shalt.err (!%p2642_p9)
}
 0x9e0   :  { %2269 = dma.vmem_to_hbm [thread:$0]  %s2267_s26, 128, %s4079_s7, [#allocation4]  }
 0x9e1   :  { %2656 = dma.done.wait [#allocation4], 128  }
 0x9e2   :  { %2657 = vsyncadd [#allocation4], 4294967168 }
 0x9e3   :  { %2273 = vsyncpa [#allocation3], 1 }
 0x9e4   :  { %2274 = vsyncpa [#allocation4], 1 }

</bundles_post_ra>
